<compile_context>
chip_gen: v6e
topology: v6e:2x2x1
jax: 0.10.0
libtpu: 0.0.40
codegen_flags: <defaults>
</compile_context>

<pallas_src>
import math

import jax
import jax.numpy as jnp
from jax.experimental import pallas as pl
from jax.experimental.pallas import tpu as pltpu

# The concrete lambda this LambdaModule instance wraps.
_LAMBDA = lambda x: x * 2.0 + 1.0

_LANE_CANDIDATES = (512, 384, 256, 128)   # lane-dense last dims (multiples of 128)
_SMALL_BYPASS_BYTES = 256 * 1024          # below this, plain jnp is faster
_SAFE_BLOCK_BYTES = 4 * 1024 * 1024       # works on every generation
_SAFE_VMEM_LIMIT = 32 * 1024 * 1024


def _lambda_kernel(x_ref, o_ref):
    # Elementwise lambda body on the VPU; explicit cast keeps non-f32 /
    # promoted dtypes well-defined.
    o_ref[...] = _LAMBDA(x_ref[...]).astype(o_ref.dtype)


def _generation_params():
    """Return (block_bytes, vmem_limit_bytes, multi_tc) for the local chip."""
    try:
        info = pltpu.get_tpu_info()
        vmem_cap = int(getattr(info, "vmem_capacity_bytes"))
    except Exception:
        # Unknown chip: conservative sizes that are safe everywhere.
        return _SAFE_BLOCK_BYTES, _SAFE_VMEM_LIMIT, False
    if vmem_cap >= 96 * 1024 * 1024:
        # v5e / v6e class (128 MiB VMEM, single TensorCore): big blocks are free.
        return 8 * 1024 * 1024, 64 * 1024 * 1024, False
    # v7x class (64 MiB VMEM, 2 TensorCores): 8 MiB blocks x 2 arrays x 2
    # buffers = 32 MiB, keep limit well under physical VMEM; want grid >= 2.
    return 8 * 1024 * 1024, 40 * 1024 * 1024, True


def lambda_module_forward(x):
    """Pallas implementation of LambdaModule(lambda x: x * 2.0 + 1.0)(x)."""
    orig_shape = x.shape
    in_dtype = x.dtype
    total = math.prod(orig_shape) if orig_shape else 1

    # Output dtype exactly as the lambda's own promotion rules dictate
    # (e.g. f32->f32, bf16->bf16, int32 -> f32).
    out_dtype = jax.eval_shape(_LAMBDA, jax.ShapeDtypeStruct((), in_dtype)).dtype

    in_itemsize = jnp.dtype(in_dtype).itemsize
    out_itemsize = jnp.dtype(out_dtype).itemsize

    # Tiny-input bypass: kernel launch overhead dwarfs one fused FMA.
    if total * in_itemsize < _SMALL_BYPASS_BYTES:
        return _LAMBDA(x)

    block_bytes, vmem_limit, multi_tc = _generation_params()

    # Split off any <128-element remainder; the main slab stays pad-free.
    tail = total % 128
    main = total - tail

    x_flat = x.reshape(-1)

    if main == 0:
        # Can't happen above the bypass threshold, but keep it safe.
        return _LAMBDA(x)

    # Largest lane-dense width that divides the main slab exactly.
    lane = next(l for l in _LANE_CANDIDATES if main % l == 0)
    rows = main // lane

    # Minimum sublane multiple for the (wider of the two) dtypes.
    sublane = max(8, 32 // min(in_itemsize, out_itemsize))

    # Target rows per block from the generation-aware block-byte budget.
    target_rows = max(
        sublane, (block_bytes // (lane * in_itemsize)) // sublane * sublane
    )

    if multi_tc:
        # v7x: make sure there are >= 2 grid steps for mid-sized inputs so both
        # TensorCores get work, but never shrink a block below ~1 MiB.
        half_rows = max(sublane, (rows // 2) // sublane * sublane)
        floor_rows = max(
            sublane, ((1024 * 1024) // (lane * in_itemsize)) // sublane * sublane
        )
        target_rows = min(target_rows, max(half_rows, floor_rows))

    tile_rows = min(rows, target_rows)
    grid = (pl.cdiv(rows, tile_rows),)   # last block may be partial -> masked

    x2d = x_flat[:main].reshape(rows, lane)

    out2d = pl.pallas_call(
        _lambda_kernel,
        out_shape=jax.ShapeDtypeStruct((rows, lane), out_dtype),
        grid_spec=pltpu.PrefetchScalarGridSpec(
            num_scalar_prefetch=0,
            grid=grid,
            in_specs=[pl.BlockSpec((tile_rows, lane), lambda i: (i, 0))],
            out_specs=pl.BlockSpec((tile_rows, lane), lambda i: (i, 0)),
        ),
        compiler_params=pltpu.CompilerParams(
            dimension_semantics=("parallel",),
            vmem_limit_bytes=vmem_limit,
        ),
        cost_estimate=pl.CostEstimate(
            flops=2 * main,
            transcendentals=0,
            bytes_accessed=main * (in_itemsize + out_itemsize),
        ),
    )(x2d)

    out_flat = out2d.reshape(-1)
    if tail:
        # Rare path (total not a multiple of 128): tiny tail in plain jnp.
        # TODO(synk): the concatenate costs one extra output pass; acceptable
        # for the rare non-128-divisible case.
        tail_out = _LAMBDA(x_flat[main:])
        out_flat = jnp.concatenate([out_flat, tail_out])
    return out_flat.reshape(orig_shape)


if __name__ == "__main__":
    key = jax.random.PRNGKey(0)

    # Small NCHW input consistent with the module: (B, C, H, W).
    # (Takes the tiny-input bypass path -- semantics identical.)
    x = jax.random.normal(key, (2, 4, 16, 16), dtype=jnp.float32)
    y = jax.block_until_ready(lambda_module_forward(x))
    assert y.shape == x.shape and y.dtype == x.dtype
    assert jnp.allclose(y, x * 2.0 + 1.0, atol=1e-6, rtol=1e-6)

    # Medium input (1 MiB, 128-divisible) that exercises the Pallas kernel.
    x_med = jax.random.normal(jax.random.PRNGKey(1), (4, 16, 64, 64), dtype=jnp.float32)
    y_med = jax.block_until_ready(lambda_module_forward(x_med))
    assert y_med.shape == x_med.shape and y_med.dtype == x_med.dtype
    assert jnp.allclose(y_med, x_med * 2.0 + 1.0, atol=1e-6, rtol=1e-6)

    # Non-128-divisible total above the bypass threshold: Pallas main slab
    # plus tiny jnp tail.
    x_odd = jax.random.normal(jax.random.PRNGKey(2), (3, 37, 41, 17), dtype=jnp.float32)
    y_odd = jax.block_until_ready(lambda_module_forward(x_odd))
    assert y_odd.shape == x_odd.shape
    assert jnp.allclose(y_odd, x_odd * 2.0 + 1.0, atol=1e-6, rtol=1e-6)

    # bf16 path (stays bf16 via weak-typed constants).
    x_bf = jax.random.normal(jax.random.PRNGKey(3), (4, 16, 64, 64), dtype=jnp.bfloat16)
    y_bf = jax.block_until_ready(lambda_module_forward(x_bf))
    assert y_bf.dtype == jnp.bfloat16
    assert jnp.allclose(
        y_bf.astype(jnp.float32),
        (x_bf * 2.0 + 1.0).astype(jnp.float32),
        atol=1e-2, rtol=1e-2,
    )

    print("KERNEL_OK")
</pallas_src>

<mosaic_0001>
module attributes {stable_mosaic.version = 11 : i64} {
  func.func @_lambda_kernel(%arg0: i32, %arg1: memref<512x512xf32, #tpu.memory_space<vmem>>, %arg2: memref<512x512xf32, #tpu.memory_space<vmem>>) attributes {dimension_semantics = [#tpu.dimension_semantics<parallel>], iteration_bounds = array<i64: 1>, scalar_prefetch = 0 : i64, scratch_operands = 0 : i64, tpu.core_type = #tpu.core_type<tc>, window_params = [{transform_indices = @transform_0, window_bounds = array<i64: 512, 512>}, {transform_indices = @transform_1, window_bounds = array<i64: 512, 512>}]} {
    %c0 = arith.constant 0 : index
    %c0_0 = arith.constant 0 : index
    %0 = vector.load %arg1[%c0, %c0_0] : memref<512x512xf32, #tpu.memory_space<vmem>>, vector<512x512xf32>
    %cst = arith.constant 2.000000e+00 : f32
    %1 = vector.broadcast %cst : f32 to vector<512x512xf32>
    %2 = arith.mulf %0, %1 : vector<512x512xf32>
    %cst_1 = arith.constant 1.000000e+00 : f32
    %3 = vector.broadcast %cst_1 : f32 to vector<512x512xf32>
    %4 = arith.addf %2, %3 : vector<512x512xf32>
    %c0_2 = arith.constant 0 : index
    %c0_3 = arith.constant 0 : index
    %5 = vector.load %arg2[%c0_2, %c0_3] : memref<512x512xf32, #tpu.memory_space<vmem>>, vector<512x512xf32>
    tpu.vector_store %arg2[%c0_2, %c0_3], %4 {strides = array<i32>} : memref<512x512xf32, #tpu.memory_space<vmem>>, vector<512x512xf32>,
    return
  }
  func.func @transform_0(%arg0: i32) -> (i32, i32) {
    %c0_i32 = arith.constant 0 : i32
    %c0_i32_0 = arith.constant 0 : i32
    return %arg0, %c0_i32 : i32, i32
  }
  func.func @transform_1(%arg0: i32) -> (i32, i32) {
    %c0_i32 = arith.constant 0 : i32
    %c0_i32_0 = arith.constant 0 : i32
    return %arg0, %c0_i32 : i32, i32
  }
}

</mosaic_0001>

<bundles_post_ra>
// kernel: tpu_custom_call.1
= control target key start
LH: loop header
LB: loop body
LE: loop exit
PB: predicated region body
PF: predicated region fallthrough
CT: control target
= control target key end

     0   :  { %6 = vsyncpa [#allocation3], 0  ;;  %s1138_s0 = inlined_call_operand.hbm [shape: f32[512,512], index: 0, kind: input, shape index: {}]   ;;  %s1139_s1 = inlined_call_operand.hbm [shape: f32[512,512], index: 1, kind: output, shape index: {}]  }
   0x1   :  { %7 = vsyncpa [#allocation4], 0  ;;  %s1112_s6 = smov [#allocation2]  }
   0x2   :  { %s13_s7 = sshll.u32 %s1112_s6, 4  ;;  %s14_s7 = int_to_ptr.vmem [resolvable:$true] %s13_s7 }
   0x3   :  { %s1076_s8 = scalar_lea.vmem %s14_s7, 32768  ;;  %p1081_p1 = scmp.lt.s32.totalorder %s14_s7, %s14_s7 }
   0x4   :  { %p1077_p0 = scmp.ne.s32.totalorder %s14_s7, %s1076_s8  ;;  %p1082_p2 = scmp.lt.s32.totalorder %s1076_s8, %s1076_s8 }
   0x6   :  { %p1083_p3 = por %p1082_p2, %p1081_p1 }
   0x8   :  { %p1084_p4 = pnand %p1083_p3, %p1077_p0 }
   0xa   :  { %1087 = shalt.err (!%p1084_p4)
}
   0xb   :  { %s1113_s9 = smov 512   ;;  %s1114_s10 = smov 32  }
   0xc   :  { %19 = dma.hbm_to_vmem [thread:$0]  %s1138_s0, 32768, %s14_s7, [#allocation3], %s1113_s9, %s1113_s9, %s1114_s10  }
   0xd   :  { %1108 = dma.done.wait [#allocation3], 32768  }
   0xe   :  { %1109 = vsyncadd [#allocation3], 4294934528  ;;  %v23_v0 = vld [vmem:[#allocation2] sm:$0xff]  ;;  %v24_v1 = vld [vmem:[#allocation2 + $0x8] sm:$0xff]  ;;  %s1115_s0 = smov [#allocation5]  }
   0xf   :  { %v25_v2 = vld [vmem:[#allocation2 + $0x10] sm:$0xff]  ;;  %v279_v3 = vmul.f32 2.0, %v23_v0  ;;  %v280_v4 = vmul.f32 2.0, %v24_v1  ;;  %v26_v6 = vld [vmem:[#allocation2 + $0x18] sm:$0xff]  ;;  %v27_v7 = vld [vmem:[#allocation2 + $0x20] sm:$0xff]  ;;  %s1052_s13 = sshll.u32 %s1115_s0, 4  ;;  %s1053_s13 = int_to_ptr.vmem [resolvable:$true] %s1052_s13 }
  0x10   :  { %v281_v5 = vmul.f32 2.0, %v25_v2  ;;  %v28_v8 = vld [vmem:[#allocation2 + $0x28] sm:$0xff]  ;;  %v282_v9 = vmul.f32 2.0, %v26_v6  ;;  %v283_v10 = vmul.f32 2.0, %v27_v7  ;;  %v29_v12 = vld [vmem:[#allocation2 + $0x30] sm:$0xff]  ;;  %v30_v13 = vld [vmem:[#allocation2 + $0x38] sm:$0xff]  ;;  %p1093_p6 = scmp.lt.s32.totalorder %s1053_s13, %s1053_s13 }
  0x11   :  { %v284_v11 = vmul.f32 2.0, %v28_v8  ;;  %v31_v14 = vld [vmem:[#allocation2 + $0x40] sm:$0xff]  ;;  %v535_v15 = vadd.f32 1.0, %v279_v3  ;;  %v536_v16 = vadd.f32 1.0, %v280_v4  ;;  %v285_v18 = vmul.f32 2.0, %v29_v12  ;;  %v32_v19 = vld [vmem:[#allocation2 + $0x48] sm:$0xff] }
  0x12   :  { %v537_v17 = vadd.f32 1.0, %v281_v5  ;;  %v33_v20 = vld [vmem:[#allocation2 + $0x50] sm:$0xff]  ;;  %v538_v21 = vadd.f32 1.0, %v282_v9  ;;  %v539_v22 = vadd.f32 1.0, %v283_v10  ;;  %v286_v24 = vmul.f32 2.0, %v30_v13  ;;  %v34_v25 = vld [vmem:[#allocation2 + $0x58] sm:$0xff] }
  0x13   :  { %v540_v23 = vadd.f32 1.0, %v284_v11  ;;  %v35_v26 = vld [vmem:[#allocation2 + $0x60] sm:$0xff]  ;;  %791 = vst [vmem:[#allocation5] sm:$0xff] %v535_v15  ;;  %792 = vst [vmem:[#allocation5 + $0x8] sm:$0xff] %v536_v16  ;;  %v541_v27 = vadd.f32 1.0, %v285_v18  ;;  %v287_v28 = vmul.f32 2.0, %v31_v14 }
  0x14   :  { %793 = vst [vmem:[#allocation5 + $0x10] sm:$0xff] %v537_v17  ;;  %v288_v29 = vmul.f32 2.0, %v32_v19  ;;  %v289_v30 = vmul.f32 2.0, %v33_v20  ;;  %v36_v31 = vld [vmem:[#allocation2 + $0x68] sm:$0xff]  ;;  %v37_v32 = vld [vmem:[#allocation2 + $0x70] sm:$0xff]  ;;  %794 = vst [vmem:[#allocation5 + $0x18] sm:$0xff] %v538_v21 }
  0x15   :  { %795 = vst [vmem:[#allocation5 + $0x20] sm:$0xff] %v539_v22  ;;  %796 = vst [vmem:[#allocation5 + $0x28] sm:$0xff] %v540_v23  ;;  %v542_v33 = vadd.f32 1.0, %v286_v24  ;;  %v290_v34 = vmul.f32 2.0, %v34_v25  ;;  %v291_v35 = vmul.f32 2.0, %v35_v26  ;;  %v292_v36 = vmul.f32 2.0, %v36_v31 }
  0x16   :  { %v38_v37 = vld [vmem:[#allocation2 + $0x78] sm:$0xff]  ;;  %v39_v38 = vld [vmem:[#allocation2 + $0x80] sm:$0xff]  ;;  %797 = vst [vmem:[#allocation5 + $0x30] sm:$0xff] %v541_v27  ;;  %v543_v39 = vadd.f32 1.0, %v287_v28  ;;  %v544_v40 = vadd.f32 1.0, %v288_v29  ;;  %v545_v41 = vadd.f32 1.0, %v289_v30 }
  0x17   :  { %v293_v42 = vmul.f32 2.0, %v37_v32  ;;  %v40_v43 = vld [vmem:[#allocation2 + $0x88] sm:$0xff]  ;;  %v41_v44 = vld [vmem:[#allocation2 + $0x90] sm:$0xff]  ;;  %798 = vst [vmem:[#allocation5 + $0x38] sm:$0xff] %v542_v33  ;;  %v546_v45 = vadd.f32 1.0, %v290_v34  ;;  %v547_v46 = vadd.f32 1.0, %v291_v35 }
  0x18   :  { %v548_v47 = vadd.f32 1.0, %v292_v36  ;;  %v294_v48 = vmul.f32 2.0, %v38_v37  ;;  %v42_v49 = vld [vmem:[#allocation2 + $0x98] sm:$0xff]  ;;  %v43_v50 = vld [vmem:[#allocation2 + $0xa0] sm:$0xff]  ;;  %799 = vst [vmem:[#allocation5 + $0x40] sm:$0xff] %v543_v39  ;;  %800 = vst [vmem:[#allocation5 + $0x48] sm:$0xff] %v544_v40 }
  0x19   :  { %801 = vst [vmem:[#allocation5 + $0x50] sm:$0xff] %v545_v41  ;;  %v549_v51 = vadd.f32 1.0, %v293_v42  ;;  %v295_v52 = vmul.f32 2.0, %v39_v38  ;;  %v296_v53 = vmul.f32 2.0, %v40_v43  ;;  %v297_v54 = vmul.f32 2.0, %v41_v44  ;;  %v44_v55 = vld [vmem:[#allocation2 + $0xa8] sm:$0xff] }
  0x1a   :  { %v45_v56 = vld [vmem:[#allocation2 + $0xb0] sm:$0xff]  ;;  %802 = vst [vmem:[#allocation5 + $0x58] sm:$0xff] %v546_v45  ;;  %803 = vst [vmem:[#allocation5 + $0x60] sm:$0xff] %v547_v46  ;;  %v550_v57 = vadd.f32 1.0, %v294_v48  ;;  %v298_v58 = vmul.f32 2.0, %v42_v49  ;;  %v299_v59 = vmul.f32 2.0, %v43_v50 }
  0x1b   :  { %804 = vst [vmem:[#allocation5 + $0x68] sm:$0xff] %v548_v47  ;;  %v300_v60 = vmul.f32 2.0, %v44_v55  ;;  %v46_v61 = vld [vmem:[#allocation2 + $0xb8] sm:$0xff]  ;;  %v47_v62 = vld [vmem:[#allocation2 + $0xc0] sm:$0xff]  ;;  %805 = vst [vmem:[#allocation5 + $0x70] sm:$0xff] %v549_v51  ;;  %v551_v63 = vadd.f32 1.0, %v295_v52 }
  0x1c   :  { %v552_v0 = vadd.f32 1.0, %v296_v53  ;;  %v553_v1 = vadd.f32 1.0, %v297_v54  ;;  %v301_v2 = vmul.f32 2.0, %v45_v56  ;;  %v48_v3 = vld [vmem:[#allocation2 + $0xc8] sm:$0xff]  ;;  %v49_v4 = vld [vmem:[#allocation2 + $0xd0] sm:$0xff]  ;;  %806 = vst [vmem:[#allocation5 + $0x78] sm:$0xff] %v550_v57 }
  0x1d   :  { %v554_v5 = vadd.f32 1.0, %v298_v58  ;;  %v555_v6 = vadd.f32 1.0, %v299_v59  ;;  %v556_v7 = vadd.f32 1.0, %v300_v60  ;;  %v302_v8 = vmul.f32 2.0, %v46_v61  ;;  %v50_v9 = vld [vmem:[#allocation2 + $0xd8] sm:$0xff]  ;;  %v51_v10 = vld [vmem:[#allocation2 + $0xe0] sm:$0xff] }
  0x1e   :  { %807 = vst [vmem:[#allocation5 + $0x80] sm:$0xff] %v551_v63  ;;  %808 = vst [vmem:[#allocation5 + $0x88] sm:$0xff] %v552_v0  ;;  %v557_v11 = vadd.f32 1.0, %v301_v2  ;;  %v303_v12 = vmul.f32 2.0, %v47_v62  ;;  %v304_v13 = vmul.f32 2.0, %v48_v3  ;;  %v305_v14 = vmul.f32 2.0, %v49_v4 }
  0x1f   :  { %809 = vst [vmem:[#allocation5 + $0x90] sm:$0xff] %v553_v1  ;;  %v52_v15 = vld [vmem:[#allocation2 + $0xe8] sm:$0xff]  ;;  %v53_v16 = vld [vmem:[#allocation2 + $0xf0] sm:$0xff]  ;;  %810 = vst [vmem:[#allocation5 + $0x98] sm:$0xff] %v554_v5  ;;  %v558_v17 = vadd.f32 1.0, %v302_v8  ;;  %v306_v18 = vmul.f32 2.0, %v50_v9 }
  0x20   :  { %811 = vst [vmem:[#allocation5 + $0xa0] sm:$0xff] %v555_v6  ;;  %812 = vst [vmem:[#allocation5 + $0xa8] sm:$0xff] %v556_v7  ;;  %v307_v19 = vmul.f32 2.0, %v51_v10  ;;  %v308_v20 = vmul.f32 2.0, %v52_v15  ;;  %v54_v21 = vld [vmem:[#allocation2 + $0xf8] sm:$0xff]  ;;  %v55_v22 = vld [vmem:[#allocation2 + $0x100] sm:$0xff] }
  0x21   :  { %813 = vst [vmem:[#allocation5 + $0xb0] sm:$0xff] %v557_v11  ;;  %v559_v23 = vadd.f32 1.0, %v303_v12  ;;  %v560_v24 = vadd.f32 1.0, %v304_v13  ;;  %v561_v25 = vadd.f32 1.0, %v305_v14  ;;  %v309_v26 = vmul.f32 2.0, %v53_v16  ;;  %v56_v27 = vld [vmem:[#allocation2 + $0x108] sm:$0xff] }
  0x22   :  { %v57_v28 = vld [vmem:[#allocation2 + $0x110] sm:$0xff]  ;;  %814 = vst [vmem:[#allocation5 + $0xb8] sm:$0xff] %v558_v17  ;;  %v562_v29 = vadd.f32 1.0, %v306_v18  ;;  %v563_v30 = vadd.f32 1.0, %v307_v19  ;;  %v564_v31 = vadd.f32 1.0, %v308_v20  ;;  %v310_v32 = vmul.f32 2.0, %v54_v21 }
  0x23   :  { %v58_v33 = vld [vmem:[#allocation2 + $0x118] sm:$0xff]  ;;  %v59_v34 = vld [vmem:[#allocation2 + $0x120] sm:$0xff]  ;;  %815 = vst [vmem:[#allocation5 + $0xc0] sm:$0xff] %v559_v23  ;;  %816 = vst [vmem:[#allocation5 + $0xc8] sm:$0xff] %v560_v24  ;;  %v565_v35 = vadd.f32 1.0, %v309_v26  ;;  %v311_v36 = vmul.f32 2.0, %v55_v22 }
  0x24   :  { %817 = vst [vmem:[#allocation5 + $0xd0] sm:$0xff] %v561_v25  ;;  %v312_v37 = vmul.f32 2.0, %v56_v27  ;;  %v313_v38 = vmul.f32 2.0, %v57_v28  ;;  %v60_v39 = vld [vmem:[#allocation2 + $0x128] sm:$0xff]  ;;  %v61_v40 = vld [vmem:[#allocation2 + $0x130] sm:$0xff]  ;;  %818 = vst [vmem:[#allocation5 + $0xd8] sm:$0xff] %v562_v29 }
  0x25   :  { %819 = vst [vmem:[#allocation5 + $0xe0] sm:$0xff] %v563_v30  ;;  %820 = vst [vmem:[#allocation5 + $0xe8] sm:$0xff] %v564_v31  ;;  %v566_v41 = vadd.f32 1.0, %v310_v32  ;;  %v314_v42 = vmul.f32 2.0, %v58_v33  ;;  %v315_v43 = vmul.f32 2.0, %v59_v34  ;;  %v316_v44 = vmul.f32 2.0, %v60_v39 }
  0x26   :  { %v62_v45 = vld [vmem:[#allocation2 + $0x138] sm:$0xff]  ;;  %v63_v46 = vld [vmem:[#allocation2 + $0x140] sm:$0xff]  ;;  %821 = vst [vmem:[#allocation5 + $0xf0] sm:$0xff] %v565_v35  ;;  %v567_v47 = vadd.f32 1.0, %v311_v36  ;;  %v568_v48 = vadd.f32 1.0, %v312_v37  ;;  %v569_v49 = vadd.f32 1.0, %v313_v38 }
  0x27   :  { %v317_v50 = vmul.f32 2.0, %v61_v40  ;;  %v64_v51 = vld [vmem:[#allocation2 + $0x148] sm:$0xff]  ;;  %v65_v52 = vld [vmem:[#allocation2 + $0x150] sm:$0xff]  ;;  %822 = vst [vmem:[#allocation5 + $0xf8] sm:$0xff] %v566_v41  ;;  %v570_v53 = vadd.f32 1.0, %v314_v42  ;;  %v571_v54 = vadd.f32 1.0, %v315_v43 }
  0x28   :  { %v572_v55 = vadd.f32 1.0, %v316_v44  ;;  %v318_v56 = vmul.f32 2.0, %v62_v45  ;;  %v66_v57 = vld [vmem:[#allocation2 + $0x158] sm:$0xff]  ;;  %v67_v58 = vld [vmem:[#allocation2 + $0x160] sm:$0xff]  ;;  %823 = vst [vmem:[#allocation5 + $0x100] sm:$0xff] %v567_v47  ;;  %824 = vst [vmem:[#allocation5 + $0x108] sm:$0xff] %v568_v48 }
  0x29   :  { %825 = vst [vmem:[#allocation5 + $0x110] sm:$0xff] %v569_v49  ;;  %v573_v59 = vadd.f32 1.0, %v317_v50  ;;  %v319_v60 = vmul.f32 2.0, %v63_v46  ;;  %v320_v61 = vmul.f32 2.0, %v64_v51  ;;  %v321_v62 = vmul.f32 2.0, %v65_v52  ;;  %v68_v63 = vld [vmem:[#allocation2 + $0x168] sm:$0xff] }
  0x2a   :  { %v69_v0 = vld [vmem:[#allocation2 + $0x170] sm:$0xff]  ;;  %826 = vst [vmem:[#allocation5 + $0x118] sm:$0xff] %v570_v53  ;;  %827 = vst [vmem:[#allocation5 + $0x120] sm:$0xff] %v571_v54  ;;  %v574_v1 = vadd.f32 1.0, %v318_v56  ;;  %v322_v2 = vmul.f32 2.0, %v66_v57  ;;  %v323_v3 = vmul.f32 2.0, %v67_v58 }
  0x2b   :  { %828 = vst [vmem:[#allocation5 + $0x128] sm:$0xff] %v572_v55  ;;  %v324_v4 = vmul.f32 2.0, %v68_v63  ;;  %v70_v5 = vld [vmem:[#allocation2 + $0x178] sm:$0xff]  ;;  %v71_v6 = vld [vmem:[#allocation2 + $0x180] sm:$0xff]  ;;  %829 = vst [vmem:[#allocation5 + $0x130] sm:$0xff] %v573_v59  ;;  %v575_v7 = vadd.f32 1.0, %v319_v60 }
  0x2c   :  { %v576_v8 = vadd.f32 1.0, %v320_v61  ;;  %v577_v9 = vadd.f32 1.0, %v321_v62  ;;  %v325_v10 = vmul.f32 2.0, %v69_v0  ;;  %v72_v11 = vld [vmem:[#allocation2 + $0x188] sm:$0xff]  ;;  %v73_v12 = vld [vmem:[#allocation2 + $0x190] sm:$0xff]  ;;  %830 = vst [vmem:[#allocation5 + $0x138] sm:$0xff] %v574_v1 }
  0x2d   :  { %v578_v13 = vadd.f32 1.0, %v322_v2  ;;  %v579_v14 = vadd.f32 1.0, %v323_v3  ;;  %v580_v15 = vadd.f32 1.0, %v324_v4  ;;  %v326_v16 = vmul.f32 2.0, %v70_v5  ;;  %v74_v17 = vld [vmem:[#allocation2 + $0x198] sm:$0xff]  ;;  %v75_v18 = vld [vmem:[#allocation2 + $0x1a0] sm:$0xff] }
  0x2e   :  { %831 = vst [vmem:[#allocation5 + $0x140] sm:$0xff] %v575_v7  ;;  %832 = vst [vmem:[#allocation5 + $0x148] sm:$0xff] %v576_v8  ;;  %v581_v19 = vadd.f32 1.0, %v325_v10  ;;  %v327_v20 = vmul.f32 2.0, %v71_v6  ;;  %v328_v21 = vmul.f32 2.0, %v72_v11  ;;  %v329_v22 = vmul.f32 2.0, %v73_v12 }
  0x2f   :  { %833 = vst [vmem:[#allocation5 + $0x150] sm:$0xff] %v577_v9  ;;  %v76_v23 = vld [vmem:[#allocation2 + $0x1a8] sm:$0xff]  ;;  %v77_v24 = vld [vmem:[#allocation2 + $0x1b0] sm:$0xff]  ;;  %834 = vst [vmem:[#allocation5 + $0x158] sm:$0xff] %v578_v13  ;;  %v582_v25 = vadd.f32 1.0, %v326_v16  ;;  %v330_v26 = vmul.f32 2.0, %v74_v17 }
  0x30   :  { %835 = vst [vmem:[#allocation5 + $0x160] sm:$0xff] %v579_v14  ;;  %836 = vst [vmem:[#allocation5 + $0x168] sm:$0xff] %v580_v15  ;;  %v331_v27 = vmul.f32 2.0, %v75_v18  ;;  %v332_v28 = vmul.f32 2.0, %v76_v23  ;;  %v78_v29 = vld [vmem:[#allocation2 + $0x1b8] sm:$0xff]  ;;  %v79_v30 = vld [vmem:[#allocation2 + $0x1c0] sm:$0xff] }
  0x31   :  { %837 = vst [vmem:[#allocation5 + $0x170] sm:$0xff] %v581_v19  ;;  %v583_v31 = vadd.f32 1.0, %v327_v20  ;;  %v584_v32 = vadd.f32 1.0, %v328_v21  ;;  %v585_v33 = vadd.f32 1.0, %v329_v22  ;;  %v333_v34 = vmul.f32 2.0, %v77_v24  ;;  %v80_v35 = vld [vmem:[#allocation2 + $0x1c8] sm:$0xff] }
  0x32   :  { %v81_v36 = vld [vmem:[#allocation2 + $0x1d0] sm:$0xff]  ;;  %838 = vst [vmem:[#allocation5 + $0x178] sm:$0xff] %v582_v25  ;;  %v586_v37 = vadd.f32 1.0, %v330_v26  ;;  %v587_v38 = vadd.f32 1.0, %v331_v27  ;;  %v588_v39 = vadd.f32 1.0, %v332_v28  ;;  %v334_v40 = vmul.f32 2.0, %v78_v29 }
  0x33   :  { %v82_v41 = vld [vmem:[#allocation2 + $0x1d8] sm:$0xff]  ;;  %v83_v42 = vld [vmem:[#allocation2 + $0x1e0] sm:$0xff]  ;;  %839 = vst [vmem:[#allocation5 + $0x180] sm:$0xff] %v583_v31  ;;  %840 = vst [vmem:[#allocation5 + $0x188] sm:$0xff] %v584_v32  ;;  %v589_v43 = vadd.f32 1.0, %v333_v34  ;;  %v335_v44 = vmul.f32 2.0, %v79_v30 }
  0x34   :  { %841 = vst [vmem:[#allocation5 + $0x190] sm:$0xff] %v585_v33  ;;  %v336_v45 = vmul.f32 2.0, %v80_v35  ;;  %v337_v46 = vmul.f32 2.0, %v81_v36  ;;  %v84_v47 = vld [vmem:[#allocation2 + $0x1e8] sm:$0xff]  ;;  %v85_v48 = vld [vmem:[#allocation2 + $0x1f0] sm:$0xff]  ;;  %842 = vst [vmem:[#allocation5 + $0x198] sm:$0xff] %v586_v37 }
  0x35   :  { %843 = vst [vmem:[#allocation5 + $0x1a0] sm:$0xff] %v587_v38  ;;  %844 = vst [vmem:[#allocation5 + $0x1a8] sm:$0xff] %v588_v39  ;;  %v590_v49 = vadd.f32 1.0, %v334_v40  ;;  %v338_v50 = vmul.f32 2.0, %v82_v41  ;;  %v339_v51 = vmul.f32 2.0, %v83_v42  ;;  %v340_v52 = vmul.f32 2.0, %v84_v47 }
  0x36   :  { %v86_v53 = vld [vmem:[#allocation2 + $0x1f8] sm:$0xff]  ;;  %v87_v54 = vld [vmem:[#allocation2 + $0x200] sm:$0xff]  ;;  %845 = vst [vmem:[#allocation5 + $0x1b0] sm:$0xff] %v589_v43  ;;  %v591_v55 = vadd.f32 1.0, %v335_v44  ;;  %v592_v56 = vadd.f32 1.0, %v336_v45  ;;  %v593_v57 = vadd.f32 1.0, %v337_v46 }
  0x37   :  { %v341_v58 = vmul.f32 2.0, %v85_v48  ;;  %v88_v59 = vld [vmem:[#allocation2 + $0x208] sm:$0xff]  ;;  %v89_v60 = vld [vmem:[#allocation2 + $0x210] sm:$0xff]  ;;  %846 = vst [vmem:[#allocation5 + $0x1b8] sm:$0xff] %v590_v49  ;;  %v594_v61 = vadd.f32 1.0, %v338_v50  ;;  %v595_v62 = vadd.f32 1.0, %v339_v51 }
  0x38   :  { %v596_v63 = vadd.f32 1.0, %v340_v52  ;;  %v342_v0 = vmul.f32 2.0, %v86_v53  ;;  %v90_v1 = vld [vmem:[#allocation2 + $0x218] sm:$0xff]  ;;  %v91_v2 = vld [vmem:[#allocation2 + $0x220] sm:$0xff]  ;;  %847 = vst [vmem:[#allocation5 + $0x1c0] sm:$0xff] %v591_v55  ;;  %848 = vst [vmem:[#allocation5 + $0x1c8] sm:$0xff] %v592_v56 }
  0x39   :  { %849 = vst [vmem:[#allocation5 + $0x1d0] sm:$0xff] %v593_v57  ;;  %v597_v3 = vadd.f32 1.0, %v341_v58  ;;  %v343_v4 = vmul.f32 2.0, %v87_v54  ;;  %v344_v5 = vmul.f32 2.0, %v88_v59  ;;  %v345_v6 = vmul.f32 2.0, %v89_v60  ;;  %v92_v7 = vld [vmem:[#allocation2 + $0x228] sm:$0xff] }
  0x3a   :  { %v93_v8 = vld [vmem:[#allocation2 + $0x230] sm:$0xff]  ;;  %850 = vst [vmem:[#allocation5 + $0x1d8] sm:$0xff] %v594_v61  ;;  %851 = vst [vmem:[#allocation5 + $0x1e0] sm:$0xff] %v595_v62  ;;  %v598_v9 = vadd.f32 1.0, %v342_v0  ;;  %v346_v10 = vmul.f32 2.0, %v90_v1  ;;  %v347_v11 = vmul.f32 2.0, %v91_v2 }
  0x3b   :  { %852 = vst [vmem:[#allocation5 + $0x1e8] sm:$0xff] %v596_v63  ;;  %v348_v12 = vmul.f32 2.0, %v92_v7  ;;  %v94_v13 = vld [vmem:[#allocation2 + $0x238] sm:$0xff]  ;;  %v95_v14 = vld [vmem:[#allocation2 + $0x240] sm:$0xff]  ;;  %853 = vst [vmem:[#allocation5 + $0x1f0] sm:$0xff] %v597_v3  ;;  %v599_v15 = vadd.f32 1.0, %v343_v4 }
  0x3c   :  { %v600_v16 = vadd.f32 1.0, %v344_v5  ;;  %v601_v17 = vadd.f32 1.0, %v345_v6  ;;  %v349_v18 = vmul.f32 2.0, %v93_v8  ;;  %v96_v19 = vld [vmem:[#allocation2 + $0x248] sm:$0xff]  ;;  %v97_v20 = vld [vmem:[#allocation2 + $0x250] sm:$0xff]  ;;  %854 = vst [vmem:[#allocation5 + $0x1f8] sm:$0xff] %v598_v9 }
  0x3d   :  { %v602_v21 = vadd.f32 1.0, %v346_v10  ;;  %v603_v22 = vadd.f32 1.0, %v347_v11  ;;  %v604_v23 = vadd.f32 1.0, %v348_v12  ;;  %v350_v24 = vmul.f32 2.0, %v94_v13  ;;  %v98_v25 = vld [vmem:[#allocation2 + $0x258] sm:$0xff]  ;;  %v99_v26 = vld [vmem:[#allocation2 + $0x260] sm:$0xff] }
  0x3e   :  { %855 = vst [vmem:[#allocation5 + $0x200] sm:$0xff] %v599_v15  ;;  %856 = vst [vmem:[#allocation5 + $0x208] sm:$0xff] %v600_v16  ;;  %v605_v27 = vadd.f32 1.0, %v349_v18  ;;  %v351_v28 = vmul.f32 2.0, %v95_v14  ;;  %v352_v29 = vmul.f32 2.0, %v96_v19  ;;  %v353_v30 = vmul.f32 2.0, %v97_v20 }
  0x3f   :  { %857 = vst [vmem:[#allocation5 + $0x210] sm:$0xff] %v601_v17  ;;  %v100_v31 = vld [vmem:[#allocation2 + $0x268] sm:$0xff]  ;;  %v101_v32 = vld [vmem:[#allocation2 + $0x270] sm:$0xff]  ;;  %858 = vst [vmem:[#allocation5 + $0x218] sm:$0xff] %v602_v21  ;;  %v606_v33 = vadd.f32 1.0, %v350_v24  ;;  %v354_v34 = vmul.f32 2.0, %v98_v25 }
  0x40   :  { %859 = vst [vmem:[#allocation5 + $0x220] sm:$0xff] %v603_v22  ;;  %860 = vst [vmem:[#allocation5 + $0x228] sm:$0xff] %v604_v23  ;;  %v355_v35 = vmul.f32 2.0, %v99_v26  ;;  %v356_v36 = vmul.f32 2.0, %v100_v31  ;;  %v102_v37 = vld [vmem:[#allocation2 + $0x278] sm:$0xff]  ;;  %v103_v38 = vld [vmem:[#allocation2 + $0x280] sm:$0xff] }
  0x41   :  { %861 = vst [vmem:[#allocation5 + $0x230] sm:$0xff] %v605_v27  ;;  %v607_v39 = vadd.f32 1.0, %v351_v28  ;;  %v608_v40 = vadd.f32 1.0, %v352_v29  ;;  %v609_v41 = vadd.f32 1.0, %v353_v30  ;;  %v357_v42 = vmul.f32 2.0, %v101_v32  ;;  %v104_v43 = vld [vmem:[#allocation2 + $0x288] sm:$0xff] }
  0x42   :  { %v105_v44 = vld [vmem:[#allocation2 + $0x290] sm:$0xff]  ;;  %862 = vst [vmem:[#allocation5 + $0x238] sm:$0xff] %v606_v33  ;;  %v610_v45 = vadd.f32 1.0, %v354_v34  ;;  %v611_v46 = vadd.f32 1.0, %v355_v35  ;;  %v612_v47 = vadd.f32 1.0, %v356_v36  ;;  %v358_v48 = vmul.f32 2.0, %v102_v37 }
  0x43   :  { %v106_v49 = vld [vmem:[#allocation2 + $0x298] sm:$0xff]  ;;  %v107_v50 = vld [vmem:[#allocation2 + $0x2a0] sm:$0xff]  ;;  %863 = vst [vmem:[#allocation5 + $0x240] sm:$0xff] %v607_v39  ;;  %864 = vst [vmem:[#allocation5 + $0x248] sm:$0xff] %v608_v40  ;;  %v613_v51 = vadd.f32 1.0, %v357_v42  ;;  %v359_v52 = vmul.f32 2.0, %v103_v38 }
  0x44   :  { %865 = vst [vmem:[#allocation5 + $0x250] sm:$0xff] %v609_v41  ;;  %v360_v53 = vmul.f32 2.0, %v104_v43  ;;  %v361_v54 = vmul.f32 2.0, %v105_v44  ;;  %v108_v55 = vld [vmem:[#allocation2 + $0x2a8] sm:$0xff]  ;;  %v109_v56 = vld [vmem:[#allocation2 + $0x2b0] sm:$0xff]  ;;  %866 = vst [vmem:[#allocation5 + $0x258] sm:$0xff] %v610_v45 }
  0x45   :  { %867 = vst [vmem:[#allocation5 + $0x260] sm:$0xff] %v611_v46  ;;  %868 = vst [vmem:[#allocation5 + $0x268] sm:$0xff] %v612_v47  ;;  %v614_v57 = vadd.f32 1.0, %v358_v48  ;;  %v362_v58 = vmul.f32 2.0, %v106_v49  ;;  %v363_v59 = vmul.f32 2.0, %v107_v50  ;;  %v364_v60 = vmul.f32 2.0, %v108_v55 }
  0x46   :  { %v110_v61 = vld [vmem:[#allocation2 + $0x2b8] sm:$0xff]  ;;  %v111_v62 = vld [vmem:[#allocation2 + $0x2c0] sm:$0xff]  ;;  %869 = vst [vmem:[#allocation5 + $0x270] sm:$0xff] %v613_v51  ;;  %v615_v63 = vadd.f32 1.0, %v359_v52  ;;  %v616_v0 = vadd.f32 1.0, %v360_v53  ;;  %v617_v1 = vadd.f32 1.0, %v361_v54 }
  0x47   :  { %v365_v2 = vmul.f32 2.0, %v109_v56  ;;  %v112_v3 = vld [vmem:[#allocation2 + $0x2c8] sm:$0xff]  ;;  %v113_v4 = vld [vmem:[#allocation2 + $0x2d0] sm:$0xff]  ;;  %870 = vst [vmem:[#allocation5 + $0x278] sm:$0xff] %v614_v57  ;;  %v618_v5 = vadd.f32 1.0, %v362_v58  ;;  %v619_v6 = vadd.f32 1.0, %v363_v59 }
  0x48   :  { %v620_v7 = vadd.f32 1.0, %v364_v60  ;;  %v366_v8 = vmul.f32 2.0, %v110_v61  ;;  %v114_v9 = vld [vmem:[#allocation2 + $0x2d8] sm:$0xff]  ;;  %v115_v10 = vld [vmem:[#allocation2 + $0x2e0] sm:$0xff]  ;;  %871 = vst [vmem:[#allocation5 + $0x280] sm:$0xff] %v615_v63  ;;  %872 = vst [vmem:[#allocation5 + $0x288] sm:$0xff] %v616_v0 }
  0x49   :  { %873 = vst [vmem:[#allocation5 + $0x290] sm:$0xff] %v617_v1  ;;  %v621_v11 = vadd.f32 1.0, %v365_v2  ;;  %v367_v12 = vmul.f32 2.0, %v111_v62  ;;  %v368_v13 = vmul.f32 2.0, %v112_v3  ;;  %v369_v14 = vmul.f32 2.0, %v113_v4  ;;  %v116_v15 = vld [vmem:[#allocation2 + $0x2e8] sm:$0xff] }
  0x4a   :  { %v117_v16 = vld [vmem:[#allocation2 + $0x2f0] sm:$0xff]  ;;  %874 = vst [vmem:[#allocation5 + $0x298] sm:$0xff] %v618_v5  ;;  %875 = vst [vmem:[#allocation5 + $0x2a0] sm:$0xff] %v619_v6  ;;  %v622_v17 = vadd.f32 1.0, %v366_v8  ;;  %v370_v18 = vmul.f32 2.0, %v114_v9  ;;  %v371_v19 = vmul.f32 2.0, %v115_v10 }
  0x4b   :  { %876 = vst [vmem:[#allocation5 + $0x2a8] sm:$0xff] %v620_v7  ;;  %v372_v20 = vmul.f32 2.0, %v116_v15  ;;  %v118_v21 = vld [vmem:[#allocation2 + $0x2f8] sm:$0xff]  ;;  %v119_v22 = vld [vmem:[#allocation2 + $0x300] sm:$0xff]  ;;  %877 = vst [vmem:[#allocation5 + $0x2b0] sm:$0xff] %v621_v11  ;;  %v623_v23 = vadd.f32 1.0, %v367_v12 }
  0x4c   :  { %v624_v24 = vadd.f32 1.0, %v368_v13  ;;  %v625_v25 = vadd.f32 1.0, %v369_v14  ;;  %v373_v26 = vmul.f32 2.0, %v117_v16  ;;  %v120_v27 = vld [vmem:[#allocation2 + $0x308] sm:$0xff]  ;;  %v121_v28 = vld [vmem:[#allocation2 + $0x310] sm:$0xff]  ;;  %878 = vst [vmem:[#allocation5 + $0x2b8] sm:$0xff] %v622_v17 }
  0x4d   :  { %v626_v29 = vadd.f32 1.0, %v370_v18  ;;  %v627_v30 = vadd.f32 1.0, %v371_v19  ;;  %v628_v31 = vadd.f32 1.0, %v372_v20  ;;  %v374_v32 = vmul.f32 2.0, %v118_v21  ;;  %v122_v33 = vld [vmem:[#allocation2 + $0x318] sm:$0xff]  ;;  %v123_v34 = vld [vmem:[#allocation2 + $0x320] sm:$0xff] }
  0x4e   :  { %879 = vst [vmem:[#allocation5 + $0x2c0] sm:$0xff] %v623_v23  ;;  %880 = vst [vmem:[#allocation5 + $0x2c8] sm:$0xff] %v624_v24  ;;  %v629_v35 = vadd.f32 1.0, %v373_v26  ;;  %v375_v36 = vmul.f32 2.0, %v119_v22  ;;  %v376_v37 = vmul.f32 2.0, %v120_v27  ;;  %v377_v38 = vmul.f32 2.0, %v121_v28 }
  0x4f   :  { %881 = vst [vmem:[#allocation5 + $0x2d0] sm:$0xff] %v625_v25  ;;  %v124_v39 = vld [vmem:[#allocation2 + $0x328] sm:$0xff]  ;;  %v125_v40 = vld [vmem:[#allocation2 + $0x330] sm:$0xff]  ;;  %882 = vst [vmem:[#allocation5 + $0x2d8] sm:$0xff] %v626_v29  ;;  %v630_v41 = vadd.f32 1.0, %v374_v32  ;;  %v378_v42 = vmul.f32 2.0, %v122_v33 }
  0x50   :  { %883 = vst [vmem:[#allocation5 + $0x2e0] sm:$0xff] %v627_v30  ;;  %884 = vst [vmem:[#allocation5 + $0x2e8] sm:$0xff] %v628_v31  ;;  %v379_v43 = vmul.f32 2.0, %v123_v34  ;;  %v380_v44 = vmul.f32 2.0, %v124_v39  ;;  %v126_v45 = vld [vmem:[#allocation2 + $0x338] sm:$0xff]  ;;  %v127_v46 = vld [vmem:[#allocation2 + $0x340] sm:$0xff] }
  0x51   :  { %885 = vst [vmem:[#allocation5 + $0x2f0] sm:$0xff] %v629_v35  ;;  %v631_v47 = vadd.f32 1.0, %v375_v36  ;;  %v632_v48 = vadd.f32 1.0, %v376_v37  ;;  %v633_v49 = vadd.f32 1.0, %v377_v38  ;;  %v381_v50 = vmul.f32 2.0, %v125_v40  ;;  %v128_v51 = vld [vmem:[#allocation2 + $0x348] sm:$0xff] }
  0x52   :  { %v129_v52 = vld [vmem:[#allocation2 + $0x350] sm:$0xff]  ;;  %886 = vst [vmem:[#allocation5 + $0x2f8] sm:$0xff] %v630_v41  ;;  %v634_v53 = vadd.f32 1.0, %v378_v42  ;;  %v635_v54 = vadd.f32 1.0, %v379_v43  ;;  %v636_v55 = vadd.f32 1.0, %v380_v44  ;;  %v382_v56 = vmul.f32 2.0, %v126_v45 }
  0x53   :  { %v130_v57 = vld [vmem:[#allocation2 + $0x358] sm:$0xff]  ;;  %v131_v58 = vld [vmem:[#allocation2 + $0x360] sm:$0xff]  ;;  %887 = vst [vmem:[#allocation5 + $0x300] sm:$0xff] %v631_v47  ;;  %888 = vst [vmem:[#allocation5 + $0x308] sm:$0xff] %v632_v48  ;;  %v637_v59 = vadd.f32 1.0, %v381_v50  ;;  %v383_v60 = vmul.f32 2.0, %v127_v46 }
  0x54   :  { %889 = vst [vmem:[#allocation5 + $0x310] sm:$0xff] %v633_v49  ;;  %v384_v61 = vmul.f32 2.0, %v128_v51  ;;  %v385_v62 = vmul.f32 2.0, %v129_v52  ;;  %v132_v63 = vld [vmem:[#allocation2 + $0x368] sm:$0xff]  ;;  %v133_v0 = vld [vmem:[#allocation2 + $0x370] sm:$0xff]  ;;  %890 = vst [vmem:[#allocation5 + $0x318] sm:$0xff] %v634_v53 }
  0x55   :  { %891 = vst [vmem:[#allocation5 + $0x320] sm:$0xff] %v635_v54  ;;  %892 = vst [vmem:[#allocation5 + $0x328] sm:$0xff] %v636_v55  ;;  %v638_v1 = vadd.f32 1.0, %v382_v56  ;;  %v386_v2 = vmul.f32 2.0, %v130_v57  ;;  %v387_v3 = vmul.f32 2.0, %v131_v58  ;;  %v388_v4 = vmul.f32 2.0, %v132_v63 }
  0x56   :  { %v134_v5 = vld [vmem:[#allocation2 + $0x378] sm:$0xff]  ;;  %v135_v6 = vld [vmem:[#allocation2 + $0x380] sm:$0xff]  ;;  %893 = vst [vmem:[#allocation5 + $0x330] sm:$0xff] %v637_v59  ;;  %v639_v7 = vadd.f32 1.0, %v383_v60  ;;  %v640_v8 = vadd.f32 1.0, %v384_v61  ;;  %v641_v9 = vadd.f32 1.0, %v385_v62 }
  0x57   :  { %v389_v10 = vmul.f32 2.0, %v133_v0  ;;  %v136_v11 = vld [vmem:[#allocation2 + $0x388] sm:$0xff]  ;;  %v137_v12 = vld [vmem:[#allocation2 + $0x390] sm:$0xff]  ;;  %894 = vst [vmem:[#allocation5 + $0x338] sm:$0xff] %v638_v1  ;;  %v642_v13 = vadd.f32 1.0, %v386_v2  ;;  %v643_v14 = vadd.f32 1.0, %v387_v3 }
  0x58   :  { %v644_v15 = vadd.f32 1.0, %v388_v4  ;;  %v390_v16 = vmul.f32 2.0, %v134_v5  ;;  %v138_v17 = vld [vmem:[#allocation2 + $0x398] sm:$0xff]  ;;  %v139_v18 = vld [vmem:[#allocation2 + $0x3a0] sm:$0xff]  ;;  %895 = vst [vmem:[#allocation5 + $0x340] sm:$0xff] %v639_v7  ;;  %896 = vst [vmem:[#allocation5 + $0x348] sm:$0xff] %v640_v8 }
  0x59   :  { %897 = vst [vmem:[#allocation5 + $0x350] sm:$0xff] %v641_v9  ;;  %v645_v19 = vadd.f32 1.0, %v389_v10  ;;  %v391_v20 = vmul.f32 2.0, %v135_v6  ;;  %v392_v21 = vmul.f32 2.0, %v136_v11  ;;  %v393_v22 = vmul.f32 2.0, %v137_v12  ;;  %v140_v23 = vld [vmem:[#allocation2 + $0x3a8] sm:$0xff] }
  0x5a   :  { %v141_v24 = vld [vmem:[#allocation2 + $0x3b0] sm:$0xff]  ;;  %898 = vst [vmem:[#allocation5 + $0x358] sm:$0xff] %v642_v13  ;;  %899 = vst [vmem:[#allocation5 + $0x360] sm:$0xff] %v643_v14  ;;  %v646_v25 = vadd.f32 1.0, %v390_v16  ;;  %v394_v26 = vmul.f32 2.0, %v138_v17  ;;  %v395_v27 = vmul.f32 2.0, %v139_v18 }
  0x5b   :  { %900 = vst [vmem:[#allocation5 + $0x368] sm:$0xff] %v644_v15  ;;  %v396_v28 = vmul.f32 2.0, %v140_v23  ;;  %v142_v29 = vld [vmem:[#allocation2 + $0x3b8] sm:$0xff]  ;;  %v143_v30 = vld [vmem:[#allocation2 + $0x3c0] sm:$0xff]  ;;  %901 = vst [vmem:[#allocation5 + $0x370] sm:$0xff] %v645_v19  ;;  %v647_v31 = vadd.f32 1.0, %v391_v20 }
  0x5c   :  { %v648_v32 = vadd.f32 1.0, %v392_v21  ;;  %v649_v33 = vadd.f32 1.0, %v393_v22  ;;  %v397_v34 = vmul.f32 2.0, %v141_v24  ;;  %v144_v35 = vld [vmem:[#allocation2 + $0x3c8] sm:$0xff]  ;;  %v145_v36 = vld [vmem:[#allocation2 + $0x3d0] sm:$0xff]  ;;  %902 = vst [vmem:[#allocation5 + $0x378] sm:$0xff] %v646_v25 }
  0x5d   :  { %v650_v37 = vadd.f32 1.0, %v394_v26  ;;  %v651_v38 = vadd.f32 1.0, %v395_v27  ;;  %v652_v39 = vadd.f32 1.0, %v396_v28  ;;  %v398_v40 = vmul.f32 2.0, %v142_v29  ;;  %v146_v41 = vld [vmem:[#allocation2 + $0x3d8] sm:$0xff]  ;;  %v147_v42 = vld [vmem:[#allocation2 + $0x3e0] sm:$0xff] }
  0x5e   :  { %903 = vst [vmem:[#allocation5 + $0x380] sm:$0xff] %v647_v31  ;;  %904 = vst [vmem:[#allocation5 + $0x388] sm:$0xff] %v648_v32  ;;  %v653_v43 = vadd.f32 1.0, %v397_v34  ;;  %v399_v44 = vmul.f32 2.0, %v143_v30  ;;  %v400_v45 = vmul.f32 2.0, %v144_v35  ;;  %v401_v46 = vmul.f32 2.0, %v145_v36 }
  0x5f   :  { %905 = vst [vmem:[#allocation5 + $0x390] sm:$0xff] %v649_v33  ;;  %v148_v47 = vld [vmem:[#allocation2 + $0x3e8] sm:$0xff]  ;;  %v149_v48 = vld [vmem:[#allocation2 + $0x3f0] sm:$0xff]  ;;  %906 = vst [vmem:[#allocation5 + $0x398] sm:$0xff] %v650_v37  ;;  %v654_v49 = vadd.f32 1.0, %v398_v40  ;;  %v402_v50 = vmul.f32 2.0, %v146_v41 }
  0x60   :  { %907 = vst [vmem:[#allocation5 + $0x3a0] sm:$0xff] %v651_v38  ;;  %908 = vst [vmem:[#allocation5 + $0x3a8] sm:$0xff] %v652_v39  ;;  %v403_v51 = vmul.f32 2.0, %v147_v42  ;;  %v404_v52 = vmul.f32 2.0, %v148_v47  ;;  %v150_v53 = vld [vmem:[#allocation2 + $0x3f8] sm:$0xff]  ;;  %v151_v54 = vld [vmem:[#allocation2 + $0x400] sm:$0xff] }
  0x61   :  { %909 = vst [vmem:[#allocation5 + $0x3b0] sm:$0xff] %v653_v43  ;;  %v655_v55 = vadd.f32 1.0, %v399_v44  ;;  %v656_v56 = vadd.f32 1.0, %v400_v45  ;;  %v657_v57 = vadd.f32 1.0, %v401_v46  ;;  %v405_v58 = vmul.f32 2.0, %v149_v48  ;;  %v152_v59 = vld [vmem:[#allocation2 + $0x408] sm:$0xff] }
  0x62   :  { %v153_v60 = vld [vmem:[#allocation2 + $0x410] sm:$0xff]  ;;  %910 = vst [vmem:[#allocation5 + $0x3b8] sm:$0xff] %v654_v49  ;;  %v658_v61 = vadd.f32 1.0, %v402_v50  ;;  %v659_v62 = vadd.f32 1.0, %v403_v51  ;;  %v660_v63 = vadd.f32 1.0, %v404_v52  ;;  %v406_v0 = vmul.f32 2.0, %v150_v53 }
  0x63   :  { %v154_v1 = vld [vmem:[#allocation2 + $0x418] sm:$0xff]  ;;  %v155_v2 = vld [vmem:[#allocation2 + $0x420] sm:$0xff]  ;;  %911 = vst [vmem:[#allocation5 + $0x3c0] sm:$0xff] %v655_v55  ;;  %912 = vst [vmem:[#allocation5 + $0x3c8] sm:$0xff] %v656_v56  ;;  %v661_v3 = vadd.f32 1.0, %v405_v58  ;;  %v407_v4 = vmul.f32 2.0, %v151_v54 }
  0x64   :  { %913 = vst [vmem:[#allocation5 + $0x3d0] sm:$0xff] %v657_v57  ;;  %v408_v5 = vmul.f32 2.0, %v152_v59  ;;  %v409_v6 = vmul.f32 2.0, %v153_v60  ;;  %v156_v7 = vld [vmem:[#allocation2 + $0x428] sm:$0xff]  ;;  %v157_v8 = vld [vmem:[#allocation2 + $0x430] sm:$0xff]  ;;  %914 = vst [vmem:[#allocation5 + $0x3d8] sm:$0xff] %v658_v61 }
  0x65   :  { %915 = vst [vmem:[#allocation5 + $0x3e0] sm:$0xff] %v659_v62  ;;  %916 = vst [vmem:[#allocation5 + $0x3e8] sm:$0xff] %v660_v63  ;;  %v662_v9 = vadd.f32 1.0, %v406_v0  ;;  %v410_v10 = vmul.f32 2.0, %v154_v1  ;;  %v411_v11 = vmul.f32 2.0, %v155_v2  ;;  %v412_v12 = vmul.f32 2.0, %v156_v7 }
  0x66   :  { %v158_v13 = vld [vmem:[#allocation2 + $0x438] sm:$0xff]  ;;  %v159_v14 = vld [vmem:[#allocation2 + $0x440] sm:$0xff]  ;;  %917 = vst [vmem:[#allocation5 + $0x3f0] sm:$0xff] %v661_v3  ;;  %v663_v15 = vadd.f32 1.0, %v407_v4  ;;  %v664_v16 = vadd.f32 1.0, %v408_v5  ;;  %v665_v17 = vadd.f32 1.0, %v409_v6 }
  0x67   :  { %v413_v18 = vmul.f32 2.0, %v157_v8  ;;  %v160_v19 = vld [vmem:[#allocation2 + $0x448] sm:$0xff]  ;;  %v161_v20 = vld [vmem:[#allocation2 + $0x450] sm:$0xff]  ;;  %918 = vst [vmem:[#allocation5 + $0x3f8] sm:$0xff] %v662_v9  ;;  %v666_v21 = vadd.f32 1.0, %v410_v10  ;;  %v667_v22 = vadd.f32 1.0, %v411_v11 }
  0x68   :  { %v668_v23 = vadd.f32 1.0, %v412_v12  ;;  %v414_v24 = vmul.f32 2.0, %v158_v13  ;;  %v162_v25 = vld [vmem:[#allocation2 + $0x458] sm:$0xff]  ;;  %v163_v26 = vld [vmem:[#allocation2 + $0x460] sm:$0xff]  ;;  %919 = vst [vmem:[#allocation5 + $0x400] sm:$0xff] %v663_v15  ;;  %920 = vst [vmem:[#allocation5 + $0x408] sm:$0xff] %v664_v16 }
  0x69   :  { %921 = vst [vmem:[#allocation5 + $0x410] sm:$0xff] %v665_v17  ;;  %v669_v27 = vadd.f32 1.0, %v413_v18  ;;  %v415_v28 = vmul.f32 2.0, %v159_v14  ;;  %v416_v29 = vmul.f32 2.0, %v160_v19  ;;  %v417_v30 = vmul.f32 2.0, %v161_v20  ;;  %v164_v31 = vld [vmem:[#allocation2 + $0x468] sm:$0xff] }
  0x6a   :  { %v165_v32 = vld [vmem:[#allocation2 + $0x470] sm:$0xff]  ;;  %922 = vst [vmem:[#allocation5 + $0x418] sm:$0xff] %v666_v21  ;;  %923 = vst [vmem:[#allocation5 + $0x420] sm:$0xff] %v667_v22  ;;  %v670_v33 = vadd.f32 1.0, %v414_v24  ;;  %v418_v34 = vmul.f32 2.0, %v162_v25  ;;  %v419_v35 = vmul.f32 2.0, %v163_v26 }
  0x6b   :  { %924 = vst [vmem:[#allocation5 + $0x428] sm:$0xff] %v668_v23  ;;  %v420_v36 = vmul.f32 2.0, %v164_v31  ;;  %v166_v37 = vld [vmem:[#allocation2 + $0x478] sm:$0xff]  ;;  %v167_v38 = vld [vmem:[#allocation2 + $0x480] sm:$0xff]  ;;  %925 = vst [vmem:[#allocation5 + $0x430] sm:$0xff] %v669_v27  ;;  %v671_v39 = vadd.f32 1.0, %v415_v28 }
  0x6c   :  { %v672_v40 = vadd.f32 1.0, %v416_v29  ;;  %v673_v41 = vadd.f32 1.0, %v417_v30  ;;  %v421_v42 = vmul.f32 2.0, %v165_v32  ;;  %v168_v43 = vld [vmem:[#allocation2 + $0x488] sm:$0xff]  ;;  %v169_v44 = vld [vmem:[#allocation2 + $0x490] sm:$0xff]  ;;  %926 = vst [vmem:[#allocation5 + $0x438] sm:$0xff] %v670_v33 }
  0x6d   :  { %v674_v45 = vadd.f32 1.0, %v418_v34  ;;  %v675_v46 = vadd.f32 1.0, %v419_v35  ;;  %v676_v47 = vadd.f32 1.0, %v420_v36  ;;  %v422_v48 = vmul.f32 2.0, %v166_v37  ;;  %v170_v49 = vld [vmem:[#allocation2 + $0x498] sm:$0xff]  ;;  %v171_v50 = vld [vmem:[#allocation2 + $0x4a0] sm:$0xff] }
  0x6e   :  { %927 = vst [vmem:[#allocation5 + $0x440] sm:$0xff] %v671_v39  ;;  %928 = vst [vmem:[#allocation5 + $0x448] sm:$0xff] %v672_v40  ;;  %v677_v51 = vadd.f32 1.0, %v421_v42  ;;  %v423_v52 = vmul.f32 2.0, %v167_v38  ;;  %v424_v53 = vmul.f32 2.0, %v168_v43  ;;  %v425_v54 = vmul.f32 2.0, %v169_v44 }
  0x6f   :  { %929 = vst [vmem:[#allocation5 + $0x450] sm:$0xff] %v673_v41  ;;  %v172_v55 = vld [vmem:[#allocation2 + $0x4a8] sm:$0xff]  ;;  %v173_v56 = vld [vmem:[#allocation2 + $0x4b0] sm:$0xff]  ;;  %930 = vst [vmem:[#allocation5 + $0x458] sm:$0xff] %v674_v45  ;;  %v678_v57 = vadd.f32 1.0, %v422_v48  ;;  %v426_v58 = vmul.f32 2.0, %v170_v49 }
  0x70   :  { %931 = vst [vmem:[#allocation5 + $0x460] sm:$0xff] %v675_v46  ;;  %932 = vst [vmem:[#allocation5 + $0x468] sm:$0xff] %v676_v47  ;;  %v427_v59 = vmul.f32 2.0, %v171_v50  ;;  %v428_v60 = vmul.f32 2.0, %v172_v55  ;;  %v174_v61 = vld [vmem:[#allocation2 + $0x4b8] sm:$0xff]  ;;  %v175_v62 = vld [vmem:[#allocation2 + $0x4c0] sm:$0xff] }
  0x71   :  { %933 = vst [vmem:[#allocation5 + $0x470] sm:$0xff] %v677_v51  ;;  %v679_v63 = vadd.f32 1.0, %v423_v52  ;;  %v680_v0 = vadd.f32 1.0, %v424_v53  ;;  %v681_v1 = vadd.f32 1.0, %v425_v54  ;;  %v429_v2 = vmul.f32 2.0, %v173_v56  ;;  %v176_v3 = vld [vmem:[#allocation2 + $0x4c8] sm:$0xff] }
  0x72   :  { %v177_v4 = vld [vmem:[#allocation2 + $0x4d0] sm:$0xff]  ;;  %934 = vst [vmem:[#allocation5 + $0x478] sm:$0xff] %v678_v57  ;;  %v682_v5 = vadd.f32 1.0, %v426_v58  ;;  %v683_v6 = vadd.f32 1.0, %v427_v59  ;;  %v684_v7 = vadd.f32 1.0, %v428_v60  ;;  %v430_v8 = vmul.f32 2.0, %v174_v61 }
  0x73   :  { %v178_v9 = vld [vmem:[#allocation2 + $0x4d8] sm:$0xff]  ;;  %v179_v10 = vld [vmem:[#allocation2 + $0x4e0] sm:$0xff]  ;;  %935 = vst [vmem:[#allocation5 + $0x480] sm:$0xff] %v679_v63  ;;  %936 = vst [vmem:[#allocation5 + $0x488] sm:$0xff] %v680_v0  ;;  %v685_v11 = vadd.f32 1.0, %v429_v2  ;;  %v431_v12 = vmul.f32 2.0, %v175_v62 }
  0x74   :  { %937 = vst [vmem:[#allocation5 + $0x490] sm:$0xff] %v681_v1  ;;  %v432_v13 = vmul.f32 2.0, %v176_v3  ;;  %v433_v14 = vmul.f32 2.0, %v177_v4  ;;  %v180_v15 = vld [vmem:[#allocation2 + $0x4e8] sm:$0xff]  ;;  %v181_v16 = vld [vmem:[#allocation2 + $0x4f0] sm:$0xff]  ;;  %938 = vst [vmem:[#allocation5 + $0x498] sm:$0xff] %v682_v5 }
  0x75   :  { %939 = vst [vmem:[#allocation5 + $0x4a0] sm:$0xff] %v683_v6  ;;  %940 = vst [vmem:[#allocation5 + $0x4a8] sm:$0xff] %v684_v7  ;;  %v686_v17 = vadd.f32 1.0, %v430_v8  ;;  %v434_v18 = vmul.f32 2.0, %v178_v9  ;;  %v435_v19 = vmul.f32 2.0, %v179_v10  ;;  %v436_v20 = vmul.f32 2.0, %v180_v15 }
  0x76   :  { %v182_v21 = vld [vmem:[#allocation2 + $0x4f8] sm:$0xff]  ;;  %v183_v22 = vld [vmem:[#allocation2 + $0x500] sm:$0xff]  ;;  %941 = vst [vmem:[#allocation5 + $0x4b0] sm:$0xff] %v685_v11  ;;  %v687_v23 = vadd.f32 1.0, %v431_v12  ;;  %v688_v24 = vadd.f32 1.0, %v432_v13  ;;  %v689_v25 = vadd.f32 1.0, %v433_v14 }
  0x77   :  { %v437_v26 = vmul.f32 2.0, %v181_v16  ;;  %v184_v27 = vld [vmem:[#allocation2 + $0x508] sm:$0xff]  ;;  %v185_v28 = vld [vmem:[#allocation2 + $0x510] sm:$0xff]  ;;  %942 = vst [vmem:[#allocation5 + $0x4b8] sm:$0xff] %v686_v17  ;;  %v690_v29 = vadd.f32 1.0, %v434_v18  ;;  %v691_v30 = vadd.f32 1.0, %v435_v19 }
  0x78   :  { %v692_v31 = vadd.f32 1.0, %v436_v20  ;;  %v438_v32 = vmul.f32 2.0, %v182_v21  ;;  %v186_v33 = vld [vmem:[#allocation2 + $0x518] sm:$0xff]  ;;  %v187_v34 = vld [vmem:[#allocation2 + $0x520] sm:$0xff]  ;;  %943 = vst [vmem:[#allocation5 + $0x4c0] sm:$0xff] %v687_v23  ;;  %944 = vst [vmem:[#allocation5 + $0x4c8] sm:$0xff] %v688_v24 }
  0x79   :  { %945 = vst [vmem:[#allocation5 + $0x4d0] sm:$0xff] %v689_v25  ;;  %v693_v35 = vadd.f32 1.0, %v437_v26  ;;  %v439_v36 = vmul.f32 2.0, %v183_v22  ;;  %v440_v37 = vmul.f32 2.0, %v184_v27  ;;  %v441_v38 = vmul.f32 2.0, %v185_v28  ;;  %v188_v39 = vld [vmem:[#allocation2 + $0x528] sm:$0xff] }
  0x7a   :  { %v189_v40 = vld [vmem:[#allocation2 + $0x530] sm:$0xff]  ;;  %946 = vst [vmem:[#allocation5 + $0x4d8] sm:$0xff] %v690_v29  ;;  %947 = vst [vmem:[#allocation5 + $0x4e0] sm:$0xff] %v691_v30  ;;  %v694_v41 = vadd.f32 1.0, %v438_v32  ;;  %v442_v42 = vmul.f32 2.0, %v186_v33  ;;  %v443_v43 = vmul.f32 2.0, %v187_v34 }
  0x7b   :  { %948 = vst [vmem:[#allocation5 + $0x4e8] sm:$0xff] %v692_v31  ;;  %v444_v44 = vmul.f32 2.0, %v188_v39  ;;  %v190_v45 = vld [vmem:[#allocation2 + $0x538] sm:$0xff]  ;;  %v191_v46 = vld [vmem:[#allocation2 + $0x540] sm:$0xff]  ;;  %949 = vst [vmem:[#allocation5 + $0x4f0] sm:$0xff] %v693_v35  ;;  %v695_v47 = vadd.f32 1.0, %v439_v36 }
  0x7c   :  { %v696_v48 = vadd.f32 1.0, %v440_v37  ;;  %v697_v49 = vadd.f32 1.0, %v441_v38  ;;  %v445_v50 = vmul.f32 2.0, %v189_v40  ;;  %v192_v51 = vld [vmem:[#allocation2 + $0x548] sm:$0xff]  ;;  %v193_v52 = vld [vmem:[#allocation2 + $0x550] sm:$0xff]  ;;  %950 = vst [vmem:[#allocation5 + $0x4f8] sm:$0xff] %v694_v41 }
  0x7d   :  { %v698_v53 = vadd.f32 1.0, %v442_v42  ;;  %v699_v54 = vadd.f32 1.0, %v443_v43  ;;  %v700_v55 = vadd.f32 1.0, %v444_v44  ;;  %v446_v56 = vmul.f32 2.0, %v190_v45  ;;  %v194_v57 = vld [vmem:[#allocation2 + $0x558] sm:$0xff]  ;;  %v195_v58 = vld [vmem:[#allocation2 + $0x560] sm:$0xff] }
  0x7e   :  { %951 = vst [vmem:[#allocation5 + $0x500] sm:$0xff] %v695_v47  ;;  %952 = vst [vmem:[#allocation5 + $0x508] sm:$0xff] %v696_v48  ;;  %v701_v59 = vadd.f32 1.0, %v445_v50  ;;  %v447_v60 = vmul.f32 2.0, %v191_v46  ;;  %v448_v61 = vmul.f32 2.0, %v192_v51  ;;  %v449_v62 = vmul.f32 2.0, %v193_v52 }
  0x7f   :  { %953 = vst [vmem:[#allocation5 + $0x510] sm:$0xff] %v697_v49  ;;  %v196_v63 = vld [vmem:[#allocation2 + $0x568] sm:$0xff]  ;;  %v197_v0 = vld [vmem:[#allocation2 + $0x570] sm:$0xff]  ;;  %954 = vst [vmem:[#allocation5 + $0x518] sm:$0xff] %v698_v53  ;;  %v702_v1 = vadd.f32 1.0, %v446_v56  ;;  %v450_v2 = vmul.f32 2.0, %v194_v57 }
  0x80   :  { %955 = vst [vmem:[#allocation5 + $0x520] sm:$0xff] %v699_v54  ;;  %956 = vst [vmem:[#allocation5 + $0x528] sm:$0xff] %v700_v55  ;;  %v451_v3 = vmul.f32 2.0, %v195_v58  ;;  %v452_v4 = vmul.f32 2.0, %v196_v63  ;;  %v198_v5 = vld [vmem:[#allocation2 + $0x578] sm:$0xff]  ;;  %v199_v6 = vld [vmem:[#allocation2 + $0x580] sm:$0xff] }
  0x81   :  { %957 = vst [vmem:[#allocation5 + $0x530] sm:$0xff] %v701_v59  ;;  %v703_v7 = vadd.f32 1.0, %v447_v60  ;;  %v704_v8 = vadd.f32 1.0, %v448_v61  ;;  %v705_v9 = vadd.f32 1.0, %v449_v62  ;;  %v453_v10 = vmul.f32 2.0, %v197_v0  ;;  %v200_v11 = vld [vmem:[#allocation2 + $0x588] sm:$0xff] }
  0x82   :  { %v201_v12 = vld [vmem:[#allocation2 + $0x590] sm:$0xff]  ;;  %958 = vst [vmem:[#allocation5 + $0x538] sm:$0xff] %v702_v1  ;;  %v706_v13 = vadd.f32 1.0, %v450_v2  ;;  %v707_v14 = vadd.f32 1.0, %v451_v3  ;;  %v708_v15 = vadd.f32 1.0, %v452_v4  ;;  %v454_v16 = vmul.f32 2.0, %v198_v5 }
  0x83   :  { %v202_v17 = vld [vmem:[#allocation2 + $0x598] sm:$0xff]  ;;  %v203_v18 = vld [vmem:[#allocation2 + $0x5a0] sm:$0xff]  ;;  %959 = vst [vmem:[#allocation5 + $0x540] sm:$0xff] %v703_v7  ;;  %960 = vst [vmem:[#allocation5 + $0x548] sm:$0xff] %v704_v8  ;;  %v709_v19 = vadd.f32 1.0, %v453_v10  ;;  %v455_v20 = vmul.f32 2.0, %v199_v6 }
  0x84   :  { %961 = vst [vmem:[#allocation5 + $0x550] sm:$0xff] %v705_v9  ;;  %v456_v21 = vmul.f32 2.0, %v200_v11  ;;  %v457_v22 = vmul.f32 2.0, %v201_v12  ;;  %v204_v23 = vld [vmem:[#allocation2 + $0x5a8] sm:$0xff]  ;;  %v205_v24 = vld [vmem:[#allocation2 + $0x5b0] sm:$0xff]  ;;  %962 = vst [vmem:[#allocation5 + $0x558] sm:$0xff] %v706_v13 }
  0x85   :  { %963 = vst [vmem:[#allocation5 + $0x560] sm:$0xff] %v707_v14  ;;  %964 = vst [vmem:[#allocation5 + $0x568] sm:$0xff] %v708_v15  ;;  %v710_v25 = vadd.f32 1.0, %v454_v16  ;;  %v458_v26 = vmul.f32 2.0, %v202_v17  ;;  %v459_v27 = vmul.f32 2.0, %v203_v18  ;;  %v460_v28 = vmul.f32 2.0, %v204_v23 }
  0x86   :  { %v206_v29 = vld [vmem:[#allocation2 + $0x5b8] sm:$0xff]  ;;  %v207_v30 = vld [vmem:[#allocation2 + $0x5c0] sm:$0xff]  ;;  %965 = vst [vmem:[#allocation5 + $0x570] sm:$0xff] %v709_v19  ;;  %v711_v31 = vadd.f32 1.0, %v455_v20  ;;  %v712_v32 = vadd.f32 1.0, %v456_v21  ;;  %v713_v33 = vadd.f32 1.0, %v457_v22 }
  0x87   :  { %v461_v34 = vmul.f32 2.0, %v205_v24  ;;  %v208_v35 = vld [vmem:[#allocation2 + $0x5c8] sm:$0xff]  ;;  %v209_v36 = vld [vmem:[#allocation2 + $0x5d0] sm:$0xff]  ;;  %966 = vst [vmem:[#allocation5 + $0x578] sm:$0xff] %v710_v25  ;;  %v714_v37 = vadd.f32 1.0, %v458_v26  ;;  %v715_v38 = vadd.f32 1.0, %v459_v27 }
  0x88   :  { %v716_v39 = vadd.f32 1.0, %v460_v28  ;;  %v462_v40 = vmul.f32 2.0, %v206_v29  ;;  %v210_v41 = vld [vmem:[#allocation2 + $0x5d8] sm:$0xff]  ;;  %v211_v42 = vld [vmem:[#allocation2 + $0x5e0] sm:$0xff]  ;;  %967 = vst [vmem:[#allocation5 + $0x580] sm:$0xff] %v711_v31  ;;  %968 = vst [vmem:[#allocation5 + $0x588] sm:$0xff] %v712_v32 }
  0x89   :  { %969 = vst [vmem:[#allocation5 + $0x590] sm:$0xff] %v713_v33  ;;  %v717_v43 = vadd.f32 1.0, %v461_v34  ;;  %v463_v44 = vmul.f32 2.0, %v207_v30  ;;  %v464_v45 = vmul.f32 2.0, %v208_v35  ;;  %v465_v46 = vmul.f32 2.0, %v209_v36  ;;  %v212_v47 = vld [vmem:[#allocation2 + $0x5e8] sm:$0xff] }
  0x8a   :  { %v213_v48 = vld [vmem:[#allocation2 + $0x5f0] sm:$0xff]  ;;  %970 = vst [vmem:[#allocation5 + $0x598] sm:$0xff] %v714_v37  ;;  %971 = vst [vmem:[#allocation5 + $0x5a0] sm:$0xff] %v715_v38  ;;  %v718_v49 = vadd.f32 1.0, %v462_v40  ;;  %v466_v50 = vmul.f32 2.0, %v210_v41  ;;  %v467_v51 = vmul.f32 2.0, %v211_v42 }
  0x8b   :  { %972 = vst [vmem:[#allocation5 + $0x5a8] sm:$0xff] %v716_v39  ;;  %v468_v52 = vmul.f32 2.0, %v212_v47  ;;  %v214_v53 = vld [vmem:[#allocation2 + $0x5f8] sm:$0xff]  ;;  %v215_v54 = vld [vmem:[#allocation2 + $0x600] sm:$0xff]  ;;  %973 = vst [vmem:[#allocation5 + $0x5b0] sm:$0xff] %v717_v43  ;;  %v719_v55 = vadd.f32 1.0, %v463_v44 }
  0x8c   :  { %v720_v56 = vadd.f32 1.0, %v464_v45  ;;  %v721_v57 = vadd.f32 1.0, %v465_v46  ;;  %v469_v58 = vmul.f32 2.0, %v213_v48  ;;  %v216_v59 = vld [vmem:[#allocation2 + $0x608] sm:$0xff]  ;;  %v217_v60 = vld [vmem:[#allocation2 + $0x610] sm:$0xff]  ;;  %974 = vst [vmem:[#allocation5 + $0x5b8] sm:$0xff] %v718_v49 }
  0x8d   :  { %v722_v61 = vadd.f32 1.0, %v466_v50  ;;  %v723_v62 = vadd.f32 1.0, %v467_v51  ;;  %v724_v63 = vadd.f32 1.0, %v468_v52  ;;  %v470_v0 = vmul.f32 2.0, %v214_v53  ;;  %v218_v1 = vld [vmem:[#allocation2 + $0x618] sm:$0xff]  ;;  %v219_v2 = vld [vmem:[#allocation2 + $0x620] sm:$0xff] }
  0x8e   :  { %975 = vst [vmem:[#allocation5 + $0x5c0] sm:$0xff] %v719_v55  ;;  %976 = vst [vmem:[#allocation5 + $0x5c8] sm:$0xff] %v720_v56  ;;  %v725_v3 = vadd.f32 1.0, %v469_v58  ;;  %v471_v4 = vmul.f32 2.0, %v215_v54  ;;  %v472_v5 = vmul.f32 2.0, %v216_v59  ;;  %v473_v6 = vmul.f32 2.0, %v217_v60 }
  0x8f   :  { %977 = vst [vmem:[#allocation5 + $0x5d0] sm:$0xff] %v721_v57  ;;  %v220_v7 = vld [vmem:[#allocation2 + $0x628] sm:$0xff]  ;;  %v221_v8 = vld [vmem:[#allocation2 + $0x630] sm:$0xff]  ;;  %978 = vst [vmem:[#allocation5 + $0x5d8] sm:$0xff] %v722_v61  ;;  %v726_v9 = vadd.f32 1.0, %v470_v0  ;;  %v474_v10 = vmul.f32 2.0, %v218_v1 }
  0x90   :  { %979 = vst [vmem:[#allocation5 + $0x5e0] sm:$0xff] %v723_v62  ;;  %980 = vst [vmem:[#allocation5 + $0x5e8] sm:$0xff] %v724_v63  ;;  %v475_v11 = vmul.f32 2.0, %v219_v2  ;;  %v476_v12 = vmul.f32 2.0, %v220_v7  ;;  %v222_v13 = vld [vmem:[#allocation2 + $0x638] sm:$0xff]  ;;  %v223_v14 = vld [vmem:[#allocation2 + $0x640] sm:$0xff] }
  0x91   :  { %981 = vst [vmem:[#allocation5 + $0x5f0] sm:$0xff] %v725_v3  ;;  %v727_v15 = vadd.f32 1.0, %v471_v4  ;;  %v728_v16 = vadd.f32 1.0, %v472_v5  ;;  %v729_v17 = vadd.f32 1.0, %v473_v6  ;;  %v477_v18 = vmul.f32 2.0, %v221_v8  ;;  %v224_v19 = vld [vmem:[#allocation2 + $0x648] sm:$0xff] }
  0x92   :  { %v225_v20 = vld [vmem:[#allocation2 + $0x650] sm:$0xff]  ;;  %982 = vst [vmem:[#allocation5 + $0x5f8] sm:$0xff] %v726_v9  ;;  %v730_v21 = vadd.f32 1.0, %v474_v10  ;;  %v731_v22 = vadd.f32 1.0, %v475_v11  ;;  %v732_v23 = vadd.f32 1.0, %v476_v12  ;;  %v478_v24 = vmul.f32 2.0, %v222_v13 }
  0x93   :  { %v226_v25 = vld [vmem:[#allocation2 + $0x658] sm:$0xff]  ;;  %v227_v26 = vld [vmem:[#allocation2 + $0x660] sm:$0xff]  ;;  %983 = vst [vmem:[#allocation5 + $0x600] sm:$0xff] %v727_v15  ;;  %984 = vst [vmem:[#allocation5 + $0x608] sm:$0xff] %v728_v16  ;;  %v733_v27 = vadd.f32 1.0, %v477_v18  ;;  %v479_v28 = vmul.f32 2.0, %v223_v14 }
  0x94   :  { %985 = vst [vmem:[#allocation5 + $0x610] sm:$0xff] %v729_v17  ;;  %v480_v29 = vmul.f32 2.0, %v224_v19  ;;  %v481_v30 = vmul.f32 2.0, %v225_v20  ;;  %v228_v31 = vld [vmem:[#allocation2 + $0x668] sm:$0xff]  ;;  %v229_v32 = vld [vmem:[#allocation2 + $0x670] sm:$0xff]  ;;  %986 = vst [vmem:[#allocation5 + $0x618] sm:$0xff] %v730_v21 }
  0x95   :  { %987 = vst [vmem:[#allocation5 + $0x620] sm:$0xff] %v731_v22  ;;  %988 = vst [vmem:[#allocation5 + $0x628] sm:$0xff] %v732_v23  ;;  %v734_v33 = vadd.f32 1.0, %v478_v24  ;;  %v482_v34 = vmul.f32 2.0, %v226_v25  ;;  %v483_v35 = vmul.f32 2.0, %v227_v26  ;;  %v484_v36 = vmul.f32 2.0, %v228_v31 }
  0x96   :  { %v230_v37 = vld [vmem:[#allocation2 + $0x678] sm:$0xff]  ;;  %v231_v38 = vld [vmem:[#allocation2 + $0x680] sm:$0xff]  ;;  %989 = vst [vmem:[#allocation5 + $0x630] sm:$0xff] %v733_v27  ;;  %v735_v39 = vadd.f32 1.0, %v479_v28  ;;  %v736_v40 = vadd.f32 1.0, %v480_v29  ;;  %v737_v41 = vadd.f32 1.0, %v481_v30 }
  0x97   :  { %v485_v42 = vmul.f32 2.0, %v229_v32  ;;  %v232_v43 = vld [vmem:[#allocation2 + $0x688] sm:$0xff]  ;;  %v233_v44 = vld [vmem:[#allocation2 + $0x690] sm:$0xff]  ;;  %990 = vst [vmem:[#allocation5 + $0x638] sm:$0xff] %v734_v33  ;;  %v738_v45 = vadd.f32 1.0, %v482_v34  ;;  %v739_v46 = vadd.f32 1.0, %v483_v35 }
  0x98   :  { %v740_v47 = vadd.f32 1.0, %v484_v36  ;;  %v486_v48 = vmul.f32 2.0, %v230_v37  ;;  %v234_v49 = vld [vmem:[#allocation2 + $0x698] sm:$0xff]  ;;  %v235_v50 = vld [vmem:[#allocation2 + $0x6a0] sm:$0xff]  ;;  %991 = vst [vmem:[#allocation5 + $0x640] sm:$0xff] %v735_v39  ;;  %992 = vst [vmem:[#allocation5 + $0x648] sm:$0xff] %v736_v40 }
  0x99   :  { %993 = vst [vmem:[#allocation5 + $0x650] sm:$0xff] %v737_v41  ;;  %v741_v51 = vadd.f32 1.0, %v485_v42  ;;  %v487_v52 = vmul.f32 2.0, %v231_v38  ;;  %v488_v53 = vmul.f32 2.0, %v232_v43  ;;  %v489_v54 = vmul.f32 2.0, %v233_v44  ;;  %v236_v55 = vld [vmem:[#allocation2 + $0x6a8] sm:$0xff] }
  0x9a   :  { %v237_v56 = vld [vmem:[#allocation2 + $0x6b0] sm:$0xff]  ;;  %994 = vst [vmem:[#allocation5 + $0x658] sm:$0xff] %v738_v45  ;;  %995 = vst [vmem:[#allocation5 + $0x660] sm:$0xff] %v739_v46  ;;  %v742_v57 = vadd.f32 1.0, %v486_v48  ;;  %v490_v58 = vmul.f32 2.0, %v234_v49  ;;  %v491_v59 = vmul.f32 2.0, %v235_v50 }
  0x9b   :  { %996 = vst [vmem:[#allocation5 + $0x668] sm:$0xff] %v740_v47  ;;  %v492_v60 = vmul.f32 2.0, %v236_v55  ;;  %v238_v61 = vld [vmem:[#allocation2 + $0x6b8] sm:$0xff]  ;;  %v239_v62 = vld [vmem:[#allocation2 + $0x6c0] sm:$0xff]  ;;  %997 = vst [vmem:[#allocation5 + $0x670] sm:$0xff] %v741_v51  ;;  %v743_v63 = vadd.f32 1.0, %v487_v52 }
  0x9c   :  { %v744_v0 = vadd.f32 1.0, %v488_v53  ;;  %v745_v1 = vadd.f32 1.0, %v489_v54  ;;  %v493_v2 = vmul.f32 2.0, %v237_v56  ;;  %v240_v3 = vld [vmem:[#allocation2 + $0x6c8] sm:$0xff]  ;;  %v241_v4 = vld [vmem:[#allocation2 + $0x6d0] sm:$0xff]  ;;  %998 = vst [vmem:[#allocation5 + $0x678] sm:$0xff] %v742_v57 }
  0x9d   :  { %v746_v5 = vadd.f32 1.0, %v490_v58  ;;  %v747_v6 = vadd.f32 1.0, %v491_v59  ;;  %v748_v7 = vadd.f32 1.0, %v492_v60  ;;  %v494_v8 = vmul.f32 2.0, %v238_v61  ;;  %v242_v9 = vld [vmem:[#allocation2 + $0x6d8] sm:$0xff]  ;;  %v243_v10 = vld [vmem:[#allocation2 + $0x6e0] sm:$0xff] }
  0x9e   :  { %999 = vst [vmem:[#allocation5 + $0x680] sm:$0xff] %v743_v63  ;;  %1000 = vst [vmem:[#allocation5 + $0x688] sm:$0xff] %v744_v0  ;;  %v749_v11 = vadd.f32 1.0, %v493_v2  ;;  %v495_v12 = vmul.f32 2.0, %v239_v62  ;;  %v496_v13 = vmul.f32 2.0, %v240_v3  ;;  %v497_v14 = vmul.f32 2.0, %v241_v4 }
  0x9f   :  { %1001 = vst [vmem:[#allocation5 + $0x690] sm:$0xff] %v745_v1  ;;  %v244_v15 = vld [vmem:[#allocation2 + $0x6e8] sm:$0xff]  ;;  %v245_v16 = vld [vmem:[#allocation2 + $0x6f0] sm:$0xff]  ;;  %1002 = vst [vmem:[#allocation5 + $0x698] sm:$0xff] %v746_v5  ;;  %v750_v17 = vadd.f32 1.0, %v494_v8  ;;  %v498_v18 = vmul.f32 2.0, %v242_v9 }
  0xa0   :  { %1003 = vst [vmem:[#allocation5 + $0x6a0] sm:$0xff] %v747_v6  ;;  %1004 = vst [vmem:[#allocation5 + $0x6a8] sm:$0xff] %v748_v7  ;;  %v499_v19 = vmul.f32 2.0, %v243_v10  ;;  %v500_v20 = vmul.f32 2.0, %v244_v15  ;;  %v246_v21 = vld [vmem:[#allocation2 + $0x6f8] sm:$0xff]  ;;  %v247_v22 = vld [vmem:[#allocation2 + $0x700] sm:$0xff] }
  0xa1   :  { %1005 = vst [vmem:[#allocation5 + $0x6b0] sm:$0xff] %v749_v11  ;;  %v751_v23 = vadd.f32 1.0, %v495_v12  ;;  %v752_v24 = vadd.f32 1.0, %v496_v13  ;;  %v753_v25 = vadd.f32 1.0, %v497_v14  ;;  %v501_v26 = vmul.f32 2.0, %v245_v16  ;;  %v248_v27 = vld [vmem:[#allocation2 + $0x708] sm:$0xff] }
  0xa2   :  { %v249_v28 = vld [vmem:[#allocation2 + $0x710] sm:$0xff]  ;;  %1006 = vst [vmem:[#allocation5 + $0x6b8] sm:$0xff] %v750_v17  ;;  %v754_v29 = vadd.f32 1.0, %v498_v18  ;;  %v755_v30 = vadd.f32 1.0, %v499_v19  ;;  %v756_v31 = vadd.f32 1.0, %v500_v20  ;;  %v502_v32 = vmul.f32 2.0, %v246_v21 }
  0xa3   :  { %v250_v33 = vld [vmem:[#allocation2 + $0x718] sm:$0xff]  ;;  %v251_v34 = vld [vmem:[#allocation2 + $0x720] sm:$0xff]  ;;  %1007 = vst [vmem:[#allocation5 + $0x6c0] sm:$0xff] %v751_v23  ;;  %1008 = vst [vmem:[#allocation5 + $0x6c8] sm:$0xff] %v752_v24  ;;  %v757_v35 = vadd.f32 1.0, %v501_v26  ;;  %v503_v36 = vmul.f32 2.0, %v247_v22 }
  0xa4   :  { %1009 = vst [vmem:[#allocation5 + $0x6d0] sm:$0xff] %v753_v25  ;;  %v504_v37 = vmul.f32 2.0, %v248_v27  ;;  %v505_v38 = vmul.f32 2.0, %v249_v28  ;;  %v252_v39 = vld [vmem:[#allocation2 + $0x728] sm:$0xff]  ;;  %v253_v40 = vld [vmem:[#allocation2 + $0x730] sm:$0xff]  ;;  %1010 = vst [vmem:[#allocation5 + $0x6d8] sm:$0xff] %v754_v29 }
  0xa5   :  { %1011 = vst [vmem:[#allocation5 + $0x6e0] sm:$0xff] %v755_v30  ;;  %1012 = vst [vmem:[#allocation5 + $0x6e8] sm:$0xff] %v756_v31  ;;  %v758_v41 = vadd.f32 1.0, %v502_v32  ;;  %v506_v42 = vmul.f32 2.0, %v250_v33  ;;  %v507_v43 = vmul.f32 2.0, %v251_v34  ;;  %v508_v44 = vmul.f32 2.0, %v252_v39 }
  0xa6   :  { %v254_v45 = vld [vmem:[#allocation2 + $0x738] sm:$0xff]  ;;  %v255_v46 = vld [vmem:[#allocation2 + $0x740] sm:$0xff]  ;;  %1013 = vst [vmem:[#allocation5 + $0x6f0] sm:$0xff] %v757_v35  ;;  %v759_v47 = vadd.f32 1.0, %v503_v36  ;;  %v760_v48 = vadd.f32 1.0, %v504_v37  ;;  %v761_v49 = vadd.f32 1.0, %v505_v38 }
  0xa7   :  { %v509_v50 = vmul.f32 2.0, %v253_v40  ;;  %v256_v51 = vld [vmem:[#allocation2 + $0x748] sm:$0xff]  ;;  %v257_v52 = vld [vmem:[#allocation2 + $0x750] sm:$0xff]  ;;  %1014 = vst [vmem:[#allocation5 + $0x6f8] sm:$0xff] %v758_v41  ;;  %v762_v53 = vadd.f32 1.0, %v506_v42  ;;  %v763_v54 = vadd.f32 1.0, %v507_v43 }
  0xa8   :  { %v764_v55 = vadd.f32 1.0, %v508_v44  ;;  %v510_v56 = vmul.f32 2.0, %v254_v45  ;;  %v258_v57 = vld [vmem:[#allocation2 + $0x758] sm:$0xff]  ;;  %v259_v58 = vld [vmem:[#allocation2 + $0x760] sm:$0xff]  ;;  %1015 = vst [vmem:[#allocation5 + $0x700] sm:$0xff] %v759_v47  ;;  %1016 = vst [vmem:[#allocation5 + $0x708] sm:$0xff] %v760_v48 }
  0xa9   :  { %1017 = vst [vmem:[#allocation5 + $0x710] sm:$0xff] %v761_v49  ;;  %v765_v59 = vadd.f32 1.0, %v509_v50  ;;  %v511_v60 = vmul.f32 2.0, %v255_v46  ;;  %v512_v61 = vmul.f32 2.0, %v256_v51  ;;  %v513_v62 = vmul.f32 2.0, %v257_v52  ;;  %v260_v63 = vld [vmem:[#allocation2 + $0x768] sm:$0xff] }
  0xaa   :  { %v261_v0 = vld [vmem:[#allocation2 + $0x770] sm:$0xff]  ;;  %1018 = vst [vmem:[#allocation5 + $0x718] sm:$0xff] %v762_v53  ;;  %1019 = vst [vmem:[#allocation5 + $0x720] sm:$0xff] %v763_v54  ;;  %v766_v1 = vadd.f32 1.0, %v510_v56  ;;  %v514_v2 = vmul.f32 2.0, %v258_v57  ;;  %v515_v3 = vmul.f32 2.0, %v259_v58 }
  0xab   :  { %1020 = vst [vmem:[#allocation5 + $0x728] sm:$0xff] %v764_v55  ;;  %v516_v4 = vmul.f32 2.0, %v260_v63  ;;  %v262_v5 = vld [vmem:[#allocation2 + $0x778] sm:$0xff]  ;;  %v263_v6 = vld [vmem:[#allocation2 + $0x780] sm:$0xff]  ;;  %1021 = vst [vmem:[#allocation5 + $0x730] sm:$0xff] %v765_v59  ;;  %v767_v7 = vadd.f32 1.0, %v511_v60 }
  0xac   :  { %v768_v8 = vadd.f32 1.0, %v512_v61  ;;  %v769_v9 = vadd.f32 1.0, %v513_v62  ;;  %v517_v10 = vmul.f32 2.0, %v261_v0  ;;  %v264_v11 = vld [vmem:[#allocation2 + $0x788] sm:$0xff]  ;;  %v265_v12 = vld [vmem:[#allocation2 + $0x790] sm:$0xff]  ;;  %1022 = vst [vmem:[#allocation5 + $0x738] sm:$0xff] %v766_v1 }
  0xad   :  { %v770_v13 = vadd.f32 1.0, %v514_v2  ;;  %v771_v14 = vadd.f32 1.0, %v515_v3  ;;  %v772_v15 = vadd.f32 1.0, %v516_v4  ;;  %v518_v16 = vmul.f32 2.0, %v262_v5  ;;  %v266_v17 = vld [vmem:[#allocation2 + $0x798] sm:$0xff]  ;;  %v267_v18 = vld [vmem:[#allocation2 + $0x7a0] sm:$0xff] }
  0xae   :  { %1023 = vst [vmem:[#allocation5 + $0x740] sm:$0xff] %v767_v7  ;;  %1024 = vst [vmem:[#allocation5 + $0x748] sm:$0xff] %v768_v8  ;;  %v773_v19 = vadd.f32 1.0, %v517_v10  ;;  %v519_v20 = vmul.f32 2.0, %v263_v6  ;;  %v520_v21 = vmul.f32 2.0, %v264_v11  ;;  %v521_v22 = vmul.f32 2.0, %v265_v12 }
  0xaf   :  { %1025 = vst [vmem:[#allocation5 + $0x750] sm:$0xff] %v769_v9  ;;  %v268_v23 = vld [vmem:[#allocation2 + $0x7a8] sm:$0xff]  ;;  %v269_v24 = vld [vmem:[#allocation2 + $0x7b0] sm:$0xff]  ;;  %1026 = vst [vmem:[#allocation5 + $0x758] sm:$0xff] %v770_v13  ;;  %v774_v25 = vadd.f32 1.0, %v518_v16  ;;  %v522_v26 = vmul.f32 2.0, %v266_v17 }
  0xb0   :  { %1027 = vst [vmem:[#allocation5 + $0x760] sm:$0xff] %v771_v14  ;;  %1028 = vst [vmem:[#allocation5 + $0x768] sm:$0xff] %v772_v15  ;;  %v523_v27 = vmul.f32 2.0, %v267_v18  ;;  %v524_v28 = vmul.f32 2.0, %v268_v23  ;;  %v270_v29 = vld [vmem:[#allocation2 + $0x7b8] sm:$0xff]  ;;  %v271_v30 = vld [vmem:[#allocation2 + $0x7c0] sm:$0xff] }
  0xb1   :  { %1029 = vst [vmem:[#allocation5 + $0x770] sm:$0xff] %v773_v19  ;;  %v775_v31 = vadd.f32 1.0, %v519_v20  ;;  %v776_v32 = vadd.f32 1.0, %v520_v21  ;;  %v777_v33 = vadd.f32 1.0, %v521_v22  ;;  %v525_v34 = vmul.f32 2.0, %v269_v24  ;;  %v272_v35 = vld [vmem:[#allocation2 + $0x7c8] sm:$0xff] }
  0xb2   :  { %v273_v36 = vld [vmem:[#allocation2 + $0x7d0] sm:$0xff]  ;;  %1030 = vst [vmem:[#allocation5 + $0x778] sm:$0xff] %v774_v25  ;;  %v778_v37 = vadd.f32 1.0, %v522_v26  ;;  %v779_v38 = vadd.f32 1.0, %v523_v27  ;;  %v780_v39 = vadd.f32 1.0, %v524_v28  ;;  %v526_v40 = vmul.f32 2.0, %v270_v29 }
  0xb3   :  { %v274_v41 = vld [vmem:[#allocation2 + $0x7d8] sm:$0xff]  ;;  %v275_v42 = vld [vmem:[#allocation2 + $0x7e0] sm:$0xff]  ;;  %1031 = vst [vmem:[#allocation5 + $0x780] sm:$0xff] %v775_v31  ;;  %1032 = vst [vmem:[#allocation5 + $0x788] sm:$0xff] %v776_v32  ;;  %v781_v43 = vadd.f32 1.0, %v525_v34  ;;  %v527_v44 = vmul.f32 2.0, %v271_v30 }
  0xb4   :  { %1033 = vst [vmem:[#allocation5 + $0x790] sm:$0xff] %v777_v33  ;;  %v528_v45 = vmul.f32 2.0, %v272_v35  ;;  %v529_v46 = vmul.f32 2.0, %v273_v36  ;;  %v276_v47 = vld [vmem:[#allocation2 + $0x7e8] sm:$0xff]  ;;  %v277_v48 = vld [vmem:[#allocation2 + $0x7f0] sm:$0xff]  ;;  %1034 = vst [vmem:[#allocation5 + $0x798] sm:$0xff] %v778_v37 }
  0xb5   :  { %1035 = vst [vmem:[#allocation5 + $0x7a0] sm:$0xff] %v779_v38  ;;  %1036 = vst [vmem:[#allocation5 + $0x7a8] sm:$0xff] %v780_v39  ;;  %v782_v49 = vadd.f32 1.0, %v526_v40  ;;  %v530_v50 = vmul.f32 2.0, %v274_v41  ;;  %v531_v51 = vmul.f32 2.0, %v275_v42  ;;  %v532_v52 = vmul.f32 2.0, %v276_v47 }
  0xb6   :  { %v278_v53 = vld [vmem:[#allocation2 + $0x7f8] sm:$0xff]  ;;  %1037 = vst [vmem:[#allocation5 + $0x7b0] sm:$0xff] %v781_v43  ;;  %v783_v54 = vadd.f32 1.0, %v527_v44  ;;  %v784_v55 = vadd.f32 1.0, %v528_v45  ;;  %v785_v56 = vadd.f32 1.0, %v529_v46  ;;  %v533_v57 = vmul.f32 2.0, %v277_v48 }
  0xb7   :  { %1038 = vst [vmem:[#allocation5 + $0x7b8] sm:$0xff] %v782_v49  ;;  %v786_v58 = vadd.f32 1.0, %v530_v50  ;;  %v787_v59 = vadd.f32 1.0, %v531_v51  ;;  %v788_v60 = vadd.f32 1.0, %v532_v52  ;;  %v534_v61 = vmul.f32 2.0, %v278_v53  ;;  %s1088_s14 = scalar_lea.vmem %s1053_s13, 32768 }
  0xb8   :  { %1039 = vst [vmem:[#allocation5 + $0x7c0] sm:$0xff] %v783_v54  ;;  %1040 = vst [vmem:[#allocation5 + $0x7c8] sm:$0xff] %v784_v55  ;;  %v789_v62 = vadd.f32 1.0, %v533_v57  ;;  %p1089_p5 = scmp.ne.s32.totalorder %s1053_s13, %s1088_s14  ;;  %p1094_p7 = scmp.lt.s32.totalorder %s1088_s14, %s1088_s14 }
  0xb9   :  { %1041 = vst [vmem:[#allocation5 + $0x7d0] sm:$0xff] %v785_v56  ;;  %1042 = vst [vmem:[#allocation5 + $0x7d8] sm:$0xff] %v786_v58  ;;  %v790_v63 = vadd.f32 1.0, %v534_v61 }
  0xba   :  { %1043 = vst [vmem:[#allocation5 + $0x7e0] sm:$0xff] %v787_v59  ;;  %1044 = vst [vmem:[#allocation5 + $0x7e8] sm:$0xff] %v788_v60  ;;  %p1095_p8 = por %p1094_p7, %p1093_p6 }
  0xbb   :  { %1045 = vst [vmem:[#allocation5 + $0x7f0] sm:$0xff] %v789_v62  ;;  %1046 = vst [vmem:[#allocation5 + $0x7f8] sm:$0xff] %v790_v63 }
  0xbc   :  { %p1096_p9 = pnand %p1095_p8, %p1089_p5 }
  0xbe   :  { %1099 = shalt.err (!%p1096_p9)
}
  0xbf   :  { %1058 = dma.vmem_to_hbm [thread:$0]  %s1053_s13, 32768, %s1139_s1, [#allocation4], %s1113_s9, %s1113_s9, %s1114_s10  }
  0xc0   :  { %1110 = dma.done.wait [#allocation4], 32768  }
  0xc1   :  { %1111 = vsyncadd [#allocation4], 4294934528 }
  0xc2   :  { %1062 = vsyncpa [#allocation3], 1 }
  0xc3   :  { %1063 = vsyncpa [#allocation4], 1 }

</bundles_post_ra>
